<compile_context>
chip_gen: v7x
topology: tpu7x:2x2x1
jax: 0.10.0
libtpu: 0.0.40
codegen_flags: <defaults>
</compile_context>

<pallas_src>
import functools

import jax
import jax.numpy as jnp
from jax.experimental import pallas as pl
from jax.experimental.pallas import tpu as pltpu


# ----------------------------------------------------------------------------
# Helpers
# ----------------------------------------------------------------------------

def _round_up(x, m):
    return (x + m - 1) // m * m


def _choose_tm(M):
    """Largest convenient tile that divides M (avoids padding A)."""
    for tm in (512, 384, 256, 128, 64, 32, 16, 8):
        if M % tm == 0:
            return tm
    return min(256, _round_up(M, 8))


def _choose_tn(N, m_tiles):
    """N tile dividing N; keep >= 2 parallel tiles when M fits one tile."""
    if N % 128 != 0:
        return N
    tn = 256 if N % 256 == 0 else 128
    tn = min(tn, N)
    if m_tiles == 1 and tn == N and N >= 256:
        tn = N // 2          # two N tiles -> both v7x TensorCores busy
    return tn


def _choose_tk(K):
    """K tile: single full-K block for small K, <=768 exact divisors else."""
    if K <= 768:
        return K, K
    for tk in range(768, 127, -128):
        if K % tk == 0:
            return tk, K
    tk = 512
    return tk, _round_up(K, tk)


# ----------------------------------------------------------------------------
# Fused GEMM kernel (bf16 in / bf16 out, f32 VMEM scratch accumulator)
# ----------------------------------------------------------------------------

def _make_matmul_kernel(relu):
    def kernel(a_ref, b_ref, scale_ref, shift_ref, o_ref, acc_ref):
        k = pl.program_id(2)

        @pl.when(k == 0)
        def _():
            acc_ref[...] = jnp.zeros_like(acc_ref)

        acc_ref[...] += jnp.dot(
            a_ref[...], b_ref[...], preferred_element_type=jnp.float32
        )

        @pl.when(k == pl.num_programs(2) - 1)
        def _():
            y = acc_ref[...] * scale_ref[...] + shift_ref[...]
            if relu:
                y = jnp.maximum(y, 0.0)
            o_ref[...] = y.astype(o_ref.dtype)

    return kernel


def fused_matmul(a, b, scale, shift, relu=False, out_dtype=jnp.bfloat16):
    """C = epilogue(A @ B).  A: (M, K), B: (K, N), scale/shift: (N,)."""
    M, K = a.shape
    K2, N = b.shape
    assert K == K2
    if a.dtype != jnp.bfloat16:
        a = a.astype(jnp.bfloat16)
    if b.dtype != jnp.bfloat16:
        b = b.astype(jnp.bfloat16)

    tm = _choose_tm(M)
    Mp = _round_up(M, tm)
    if Mp != M:
        a = jnp.pad(a, ((0, Mp - M), (0, 0)))
    m_tiles = Mp // tm

    tn = _choose_tn(N, m_tiles)
    tk, Kp = _choose_tk(K)
    if Kp != K:  # fallback only; never hit for this network
        a = jnp.pad(a, ((0, 0), (0, Kp - K)))
        b = jnp.pad(b, ((0, Kp - K), (0, 0)))

    scale2 = scale.astype(jnp.float32).reshape(1, N)
    shift2 = shift.astype(jnp.float32).reshape(1, N)

    out = pl.pallas_call(
        _make_matmul_kernel(relu),
        out_shape=jax.ShapeDtypeStruct((Mp, N), out_dtype),
        grid_spec=pltpu.PrefetchScalarGridSpec(
            num_scalar_prefetch=0,
            grid=(m_tiles, N // tn, Kp // tk),
            in_specs=[
                pl.BlockSpec((tm, tk), lambda i, j, k: (i, k)),
                pl.BlockSpec((tk, tn), lambda i, j, k: (k, j)),
                pl.BlockSpec((1, tn), lambda i, j, k: (0, j)),
                pl.BlockSpec((1, tn), lambda i, j, k: (0, j)),
            ],
            out_specs=pl.BlockSpec((tm, tn), lambda i, j, k: (i, j)),
            scratch_shapes=[pltpu.VMEM((tm, tn), jnp.float32)],
        ),
        compiler_params=pltpu.CompilerParams(
            dimension_semantics=("parallel", "parallel", "arbitrary"),
            vmem_limit_bytes=32 * 1024 * 1024,
        ),
    )(a, b, scale2, shift2)

    if Mp != M:
        out = out[:M]
    return out


# ----------------------------------------------------------------------------
# Implicit-im2col 3x3 stride-1 conv + BN (+residual) (+ReLU) kernel
# ----------------------------------------------------------------------------

def _make_conv3x3_kernel(relu, has_residual, Wp, L):
    """x_ref: (Hp*Wp, Cin) flat padded image; 9 taps = static flat slices."""

    def kernel(*refs):
        if has_residual:
            x_ref, w_ref, scale_ref, shift_ref, res_ref, o_ref = refs
        else:
            x_ref, w_ref, scale_ref, shift_ref, o_ref = refs
            res_ref = None
        cout = o_ref.shape[-1]
        acc = jnp.zeros((L, cout), jnp.float32)
        for dh in range(3):
            for dw in range(3):
                off = dh * Wp + dw
                a = x_ref[off:off + L, :]                  # (L, Cin) bf16
                acc = acc + jnp.dot(
                    a, w_ref[dh, dw], preferred_element_type=jnp.float32
                )
        y = acc * scale_ref[...] + shift_ref[...]
        if has_residual:
            y = y + res_ref[...].astype(jnp.float32)
        if relu:
            y = jnp.maximum(y, 0.0)
        o_ref[...] = y.astype(o_ref.dtype)

    return kernel


def conv3x3_s1(x, w, scale, shift, relu=True, residual=None):
    """3x3 stride-1 pad-1 conv + folded BN (+residual) (+ReLU), NHWC bf16.

    Implicit im2col: the padded image is flattened to (Hp*Wp, Cin); tap
    (dh, dw) for flat output row r = ho*Wp + wo is x_flat[r + dh*Wp + dw].
    Output columns wo >= W are wrap-around garbage and are sliced off.
    """
    N, H, W, Cin = x.shape
    Cout = w.shape[-1]
    Ho, Wo = H, W
    Wp = W + 2
    Hp = H + 3          # one extra bottom row keeps every tap slice in bounds
    L = Ho * Wp

    xp = jnp.pad(x, ((0, 0), (1, 2), (1, 1), (0, 0)))
    x_flat = xp.reshape(N, Hp * Wp, Cin)

    scale2 = scale.astype(jnp.float32).reshape(1, Cout)
    shift2 = shift.astype(jnp.float32).reshape(1, Cout)

    in_specs = [
        pl.BlockSpec((None, Hp * Wp, Cin), lambda n: (n, 0, 0)),
        pl.BlockSpec((3, 3, Cin, Cout), lambda n: (0, 0, 0, 0)),
        pl.BlockSpec((1, Cout), lambda n: (0, 0)),
        pl.BlockSpec((1, Cout), lambda n: (0, 0)),
    ]
    args = [x_flat, w, scale2, shift2]
    if residual is not None:
        res_wide = jnp.pad(
            residual.astype(jnp.bfloat16),
            ((0, 0), (0, 0), (0, Wp - Wo), (0, 0)),
        ).reshape(N, L, Cout)
        in_specs.append(pl.BlockSpec((None, L, Cout), lambda n: (n, 0, 0)))
        args.append(res_wide)

    out_wide = pl.pallas_call(
        _make_conv3x3_kernel(relu, residual is not None, Wp, L),
        out_shape=jax.ShapeDtypeStruct((N, L, Cout), jnp.bfloat16),
        grid_spec=pltpu.PrefetchScalarGridSpec(
            num_scalar_prefetch=0,
            grid=(N,),
            in_specs=in_specs,
            out_specs=pl.BlockSpec((None, L, Cout), lambda n: (n, 0, 0)),
        ),
        compiler_params=pltpu.CompilerParams(
            dimension_semantics=("parallel",),
            vmem_limit_bytes=32 * 1024 * 1024,
        ),
    )(*args)

    # TODO(synk): feed the wide (Wp-column) layout directly to the next layer
    # to avoid this narrowing slice pass.
    return out_wide.reshape(N, Ho, Wp, Cout)[:, :, :Wo, :]


# ----------------------------------------------------------------------------
# Pooling kernels
# ----------------------------------------------------------------------------

def _max_reduce_kernel(x_ref, o_ref):
    o_ref[...] = jnp.max(x_ref[...], axis=1)


def _sum_reduce_kernel(inv_hw, x_ref, o_ref):
    k = pl.program_id(0)

    @pl.when(k == 0)
    def _():
        o_ref[...] = jnp.zeros_like(o_ref)

    o_ref[...] += jnp.sum(x_ref[...].astype(jnp.float32), axis=1)

    @pl.when(k == pl.num_programs(0) - 1)
    def _():
        o_ref[...] = o_ref[...] * inv_hw


def maxpool_3x3_s2(x):
    """MaxPool2d(kernel=3, stride=2, padding=1), NHWC bf16, lane-dense rows."""
    N, H, W, C = x.shape
    xp = jnp.pad(x, ((0, 0), (1, 1), (1, 1), (0, 0)), constant_values=-1e30)
    Ho = (H - 1) // 2 + 1
    Wo = (W - 1) // 2 + 1
    taps = []
    for i in range(3):
        for j in range(3):
            taps.append(jax.lax.slice(
                xp, (0, i, j, 0),
                (N, i + (Ho - 1) * 2 + 1, j + (Wo - 1) * 2 + 1, C),
                (1, 2, 2, 1)))
    pat = jnp.stack(taps, axis=2)                   # (N, Ho, 9, Wo, C)
    pat = pat.reshape(N * Ho, 9, Wo * C)            # lane-dense rows

    M = N * Ho
    row_bytes = 9 * Wo * C * 2
    cap = max(8, (4 << 20) // row_bytes)
    tm = None
    for cand in (512, 256, 128, 64, 56, 32, 28, 16, 14, 8):
        if cand <= cap and M % cand == 0:
            tm = cand
            break
    if tm is None:
        tm = max(8, min(int(cap), 256) // 8 * 8)
    Mp = _round_up(M, tm)
    if Mp != M:
        pat = jnp.pad(pat, ((0, Mp - M), (0, 0), (0, 0)))

    out = pl.pallas_call(
        _max_reduce_kernel,
        out_shape=jax.ShapeDtypeStruct((Mp, Wo * C), x.dtype),
        grid_spec=pltpu.PrefetchScalarGridSpec(
            num_scalar_prefetch=0,
            grid=(Mp // tm,),
            in_specs=[pl.BlockSpec((tm, 9, Wo * C), lambda i: (i, 0, 0))],
            out_specs=pl.BlockSpec((tm, Wo * C), lambda i: (i, 0)),
        ),
        compiler_params=pltpu.CompilerParams(
            dimension_semantics=("parallel",),
        ),
    )(pat)
    if Mp != M:
        out = out[:M]
    return out.reshape(N, Ho, Wo, C)


def global_avgpool(x):
    """AdaptiveAvgPool2d((1,1)) + flatten: (N,H,W,C) bf16 -> (N,C) f32."""
    N, H, W, C = x.shape
    HW = H * W
    flat = x.reshape(N, HW, C)
    thw = min(512, _round_up(HW, 8))
    HWp = _round_up(HW, thw)
    if HWp != HW:
        flat = jnp.pad(flat, ((0, 0), (0, HWp - HW), (0, 0)))
    return pl.pallas_call(
        functools.partial(_sum_reduce_kernel, 1.0 / HW),
        out_shape=jax.ShapeDtypeStruct((N, C), jnp.float32),
        grid_spec=pltpu.PrefetchScalarGridSpec(
            num_scalar_prefetch=0,
            grid=(HWp // thw,),
            in_specs=[pl.BlockSpec((N, thw, C), lambda k: (0, k, 0))],
            out_specs=pl.BlockSpec((N, C), lambda k: (0, 0)),
        ),
        compiler_params=pltpu.CompilerParams(
            dimension_semantics=("arbitrary",),
        ),
    )(flat)


# ----------------------------------------------------------------------------
# Plain-JAX glue: im2col (only for the 7x7 stem and the 3 stride-2 3x3 convs)
# ----------------------------------------------------------------------------

def im2col(x, kh, kw, stride, pad):
    """x: (N, H, W, C) NHWC -> patches (N*Ho*Wo, kh*kw, C), plus Ho, Wo."""
    N, H, W, C = x.shape
    if pad > 0:
        x = jnp.pad(x, ((0, 0), (pad, pad), (pad, pad), (0, 0)))
    Ho = (H + 2 * pad - kh) // stride + 1
    Wo = (W + 2 * pad - kw) // stride + 1
    cols = []
    for i in range(kh):
        for j in range(kw):
            cols.append(jax.lax.slice(
                x,
                (0, i, j, 0),
                (N, i + (Ho - 1) * stride + 1, j + (Wo - 1) * stride + 1, C),
                (1, stride, stride, 1)))
    patches = jnp.stack(cols, axis=3)  # (N, Ho, Wo, kh*kw, C)
    return patches.reshape(N * Ho * Wo, kh * kw, C), Ho, Wo


def conv3x3_s2(x, w9, scale, shift, relu=True):
    """3x3 stride-2 pad-1 conv via materialized (bf16) im2col + fused GEMM."""
    N = x.shape[0]
    cout = w9.shape[-1]
    patches, Ho, Wo = im2col(x, 3, 3, 2, 1)
    a = patches.reshape(patches.shape[0], -1)
    out = fused_matmul(a, w9, scale, shift, relu=relu)
    return out.reshape(N, Ho, Wo, cout)


# ----------------------------------------------------------------------------
# Parameters (deterministic, synthetic) + one-time inference preparation
# ----------------------------------------------------------------------------

def _he_conv(key, kh, kw, cin, cout):
    std = (2.0 / (kh * kw * cin)) ** 0.5
    return jax.random.normal(key, (kh, kw, cin, cout), jnp.float32) * std


def _bn_fold(c, eps=1e-5):
    gamma = jnp.ones((c,), jnp.float32)
    beta = jnp.zeros((c,), jnp.float32)
    mean = jnp.zeros((c,), jnp.float32)
    var = jnp.ones((c,), jnp.float32)
    scale = gamma / jnp.sqrt(var + eps)
    shift = beta - mean * scale
    return scale, shift


def init_params(key):
    keys = iter(jax.random.split(key, 64))
    p = {}
    p["conv1"] = _he_conv(next(keys), 7, 7, 3, 64)
    p["bn1"] = _bn_fold(64)

    stage_cfg = [(64, 64, 1), (64, 128, 2), (128, 256, 2), (256, 512, 2)]
    p["layers"] = []
    for cin, cout, stride in stage_cfg:
        blocks = []
        for b in range(2):
            s = stride if b == 0 else 1
            ci = cin if b == 0 else cout
            blk = {
                "conv1": _he_conv(next(keys), 3, 3, ci, cout),
                "bn1": _bn_fold(cout),
                "conv2": _he_conv(next(keys), 3, 3, cout, cout),
                "bn2": _bn_fold(cout),
            }
            if s != 1 or ci != cout:
                blk["down_conv"] = _he_conv(next(keys), 1, 1, ci, cout)
                blk["down_bn"] = _bn_fold(cout)
            blocks.append((blk, s))
        p["layers"].append(blocks)

    p["fc_w"] = jax.random.normal(next(keys), (512, 3), jnp.float32) * (
        1.0 / 512.0 ** 0.5
    )
    p["fc_b"] = jnp.zeros((3,), jnp.float32)
    return p


def prepare_params(raw):
    """One-time: fold BN, cast weights to bf16, reshape/pad to kernel layouts."""
    p = {}
    p["stem_w"] = raw["conv1"].reshape(7 * 7 * 3, 64).astype(jnp.bfloat16)
    p["stem_scale"], p["stem_shift"] = raw["bn1"]

    blocks = []
    for stage in raw["layers"]:
        for blk, s in stage:
            cin, cout = blk["conv1"].shape[2], blk["conv1"].shape[3]
            e = {"stride": s}
            if s == 1:
                e["w1"] = blk["conv1"].astype(jnp.bfloat16)           # (3,3,ci,co)
            else:
                e["w1"] = blk["conv1"].reshape(9 * cin, cout).astype(jnp.bfloat16)
            e["s1"], e["b1"] = blk["bn1"]
            e["w2"] = blk["conv2"].astype(jnp.bfloat16)               # (3,3,co,co)
            e["s2"], e["b2"] = blk["bn2"]
            if "down_conv" in blk:
                e["down_w"] = blk["down_conv"].reshape(cin, cout).astype(jnp.bfloat16)
                e["down_s"], e["down_b"] = blk["down_bn"]
            else:
                e["down_w"] = None
            blocks.append(e)
    p["blocks"] = blocks

    npad = 128  # lane-dense FC output; logits sliced to 3 afterwards
    p["fc_w"] = jnp.pad(raw["fc_w"], ((0, 0), (0, npad - 3))).astype(jnp.bfloat16)
    p["fc_b"] = jnp.pad(raw["fc_b"], (0, npad - 3)).astype(jnp.float32)
    p["fc_scale"] = jnp.ones((npad,), jnp.float32)
    return p


# ----------------------------------------------------------------------------
# Forward pass (== BurnDetectionModel.forward, inference mode)
# ----------------------------------------------------------------------------

def burn_detection_forward(params, x_nchw):
    # PyTorch gives NCHW; compute internally in NHWC bf16.
    x = jnp.transpose(x_nchw, (0, 2, 3, 1)).astype(jnp.bfloat16)
    N = x.shape[0]

    # Stem: conv7x7/2 + BN + ReLU (materialized bf16 im2col, full-K=147 block)
    patches, Ho, Wo = im2col(x, 7, 7, 2, 3)
    a = patches.reshape(patches.shape[0], -1)
    x = fused_matmul(a, params["stem_w"], params["stem_scale"],
                     params["stem_shift"], relu=True).reshape(N, Ho, Wo, 64)

    # MaxPool 3x3 / 2
    x = maxpool_3x3_s2(x)

    # Residual stages (BasicBlock x 2 per stage)
    for blk in params["blocks"]:
        identity = x
        if blk["stride"] == 1:
            out1 = conv3x3_s1(x, blk["w1"], blk["s1"], blk["b1"], relu=True)
        else:
            out1 = conv3x3_s2(x, blk["w1"], blk["s1"], blk["b1"], relu=True)
        if blk["down_w"] is not None:
            s = blk["stride"]
            xs = x[:, ::s, ::s, :]                       # 1x1/stride-s conv = GEMM
            Nb, Hs, Ws, Ci = xs.shape
            identity = fused_matmul(
                xs.reshape(Nb * Hs * Ws, Ci), blk["down_w"],
                blk["down_s"], blk["down_b"], relu=False,
            ).reshape(Nb, Hs, Ws, -1)
        # conv2 + BN + residual-add + ReLU fused in the implicit-conv epilogue
        x = conv3x3_s1(out1, blk["w2"], blk["s2"], blk["b2"],
                       relu=True, residual=identity)

    # Global average pool + flatten
    feats = global_avgpool(x)                            # (N, 512) f32

    # self.model.fc = Sequential(Dropout(0.5), Linear(512, 3));
    # Dropout is identity in eval mode.  Weight pre-padded to 128 lanes.
    logits = fused_matmul(feats, params["fc_w"], params["fc_scale"],
                          params["fc_b"], relu=False, out_dtype=jnp.float32)
    return logits[:, :3]                                 # (N, 3) f32


# ----------------------------------------------------------------------------
# Main
# ----------------------------------------------------------------------------

if __name__ == "__main__":
    key = jax.random.PRNGKey(0)
    pkey, xkey = jax.random.split(key)
    raw_params = init_params(pkey)
    params = prepare_params(raw_params)

    # Small 3-channel RGB input (NCHW like PyTorch).
    x = jax.random.normal(xkey, (2, 3, 32, 32), jnp.float32)

    out = burn_detection_forward(params, x)
    out = jax.block_until_ready(out)
    assert out.shape == (2, 3), out.shape
    assert bool(jnp.all(jnp.isfinite(out)))
    print("KERNEL_OK")
</pallas_src>

<mosaic_0001>
module attributes {stable_mosaic.version = 11 : i64} {
  func.func @kernel(%arg0: i32, %arg1: i32, %arg2: i32, %arg3: memref<512x147xbf16, #tpu.memory_space<vmem>>, %arg4: memref<147x64xbf16, #tpu.memory_space<vmem>>, %arg5: memref<1x64xf32, #tpu.memory_space<vmem>>, %arg6: memref<1x64xf32, #tpu.memory_space<vmem>>, %arg7: memref<512x64xbf16, #tpu.memory_space<vmem>>, %arg8: memref<512x64xf32, #tpu.memory_space<vmem>>) attributes {dimension_semantics = [#tpu.dimension_semantics<parallel>, #tpu.dimension_semantics<parallel>, #tpu.dimension_semantics<arbitrary>], iteration_bounds = array<i64: 1, 1, 1>, scalar_prefetch = 0 : i64, scratch_operands = 1 : i64, tpu.core_type = #tpu.core_type<tc>, window_params = [{transform_indices = @transform_0, window_bounds = array<i64: 512, 147>}, {transform_indices = @transform_1, window_bounds = array<i64: 147, 64>}, {transform_indices = @transform_2, window_bounds = array<i64: 1, 64>}, {transform_indices = @transform_3, window_bounds = array<i64: 1, 64>}, {transform_indices = @transform_4, window_bounds = array<i64: 512, 64>}]} {
    %c0_i32 = arith.constant 0 : i32
    %0 = arith.cmpi eq, %arg2, %c0_i32 : i32
    %1 = arith.extui %0 : i1 to i32
    %c0_i32_0 = arith.constant 0 : i32
    %2 = arith.cmpi ne, %1, %c0_i32_0 : i32
    scf.if %2 {
      %cst_10 = arith.constant 0.000000e+00 : f32
      %12 = vector.broadcast %cst_10 : f32 to vector<512x64xf32>
      %c0_11 = arith.constant 0 : index
      %c0_12 = arith.constant 0 : index
      %13 = vector.load %arg8[%c0_11, %c0_12] : memref<512x64xf32, #tpu.memory_space<vmem>>, vector<512x64xf32>
      tpu.vector_store %arg8[%c0_11, %c0_12], %12 {strides = array<i32>} : memref<512x64xf32, #tpu.memory_space<vmem>>, vector<512x64xf32>,
    } else {
    }
    %c0 = arith.constant 0 : index
    %c0_1 = arith.constant 0 : index
    %3 = vector.load %arg8[%c0, %c0_1] : memref<512x64xf32, #tpu.memory_space<vmem>>, vector<512x64xf32>
    %c0_2 = arith.constant 0 : index
    %c0_3 = arith.constant 0 : index
    %4 = vector.load %arg3[%c0_2, %c0_3] : memref<512x147xbf16, #tpu.memory_space<vmem>>, vector<512x147xbf16>
    %c0_4 = arith.constant 0 : index
    %c0_5 = arith.constant 0 : index
    %5 = vector.load %arg4[%c0_4, %c0_5] : memref<147x64xbf16, #tpu.memory_space<vmem>>, vector<147x64xbf16>
    %cst = arith.constant dense<0.000000e+00> : vector<512x64xf32>
    %6 = tpu.matmul %4, %5, %cst {dimension_numbers = #tpu.dot_dimension_numbers<[1], [0], [0], [1], [0, 0, 1, 1], [], []>} : vector<512x147xbf16>, vector<147x64xbf16>, vector<512x64xf32> -> vector<512x64xf32>
    %7 = arith.addf %3, %6 : vector<512x64xf32>
    %c0_6 = arith.constant 0 : index
    %c0_7 = arith.constant 0 : index
    %8 = vector.load %arg8[%c0_6, %c0_7] : memref<512x64xf32, #tpu.memory_space<vmem>>, vector<512x64xf32>
    tpu.vector_store %arg8[%c0_6, %c0_7], %7 {strides = array<i32>} : memref<512x64xf32, #tpu.memory_space<vmem>>, vector<512x64xf32>,
    %c0_i32_8 = arith.constant 0 : i32
    %9 = arith.cmpi eq, %arg2, %c0_i32_8 : i32
    %10 = arith.extui %9 : i1 to i32
    %c0_i32_9 = arith.constant 0 : i32
    %11 = arith.cmpi ne, %10, %c0_i32_9 : i32
    scf.if %11 {
      %c0_10 = arith.constant 0 : index
      %c0_11 = arith.constant 0 : index
      %12 = vector.load %arg8[%c0_10, %c0_11] : memref<512x64xf32, #tpu.memory_space<vmem>>, vector<512x64xf32>
      %c0_12 = arith.constant 0 : index
      %c0_13 = arith.constant 0 : index
      %13 = vector.load %arg5[%c0_12, %c0_13] : memref<1x64xf32, #tpu.memory_space<vmem>>, vector<1x64xf32>
      %14 = vector.broadcast %13 : vector<1x64xf32> to vector<512x64xf32>
      %15 = arith.mulf %12, %14 : vector<512x64xf32>
      %c0_14 = arith.constant 0 : index
      %c0_15 = arith.constant 0 : index
      %16 = vector.load %arg6[%c0_14, %c0_15] : memref<1x64xf32, #tpu.memory_space<vmem>>, vector<1x64xf32>
      %17 = vector.broadcast %16 : vector<1x64xf32> to vector<512x64xf32>
      %18 = arith.addf %15, %17 : vector<512x64xf32>
      %cst_16 = arith.constant 0.000000e+00 : f32
      %19 = vector.broadcast %cst_16 : f32 to vector<512x64xf32>
      %20 = arith.maximumf %18, %19 : vector<512x64xf32>
      %21 = arith.truncf %20 : vector<512x64xf32> to vector<512x64xbf16>
      %c0_17 = arith.constant 0 : index
      %c0_18 = arith.constant 0 : index
      %22 = vector.load %arg7[%c0_17, %c0_18] : memref<512x64xbf16, #tpu.memory_space<vmem>>, vector<512x64xbf16>
      tpu.vector_store %arg7[%c0_17, %c0_18], %21 {strides = array<i32>} : memref<512x64xbf16, #tpu.memory_space<vmem>>, vector<512x64xbf16>,
    } else {
    }
    return
  }
  func.func @transform_0(%arg0: i32, %arg1: i32, %arg2: i32) -> (i32, i32) {
    %c0_i32 = arith.constant 0 : i32
    return %arg0, %arg2 : i32, i32
  }
  func.func @transform_1(%arg0: i32, %arg1: i32, %arg2: i32) -> (i32, i32) {
    %c0_i32 = arith.constant 0 : i32
    return %arg2, %arg1 : i32, i32
  }
  func.func @transform_2(%arg0: i32, %arg1: i32, %arg2: i32) -> (i32, i32) {
    %c0_i32 = arith.constant 0 : i32
    %c0_i32_0 = arith.constant 0 : i32
    return %c0_i32, %arg1 : i32, i32
  }
  func.func @transform_3(%arg0: i32, %arg1: i32, %arg2: i32) -> (i32, i32) {
    %c0_i32 = arith.constant 0 : i32
    %c0_i32_0 = arith.constant 0 : i32
    return %c0_i32, %arg1 : i32, i32
  }
  func.func @transform_4(%arg0: i32, %arg1: i32, %arg2: i32) -> (i32, i32) {
    %c0_i32 = arith.constant 0 : i32
    return %arg0, %arg1 : i32, i32
  }
}

</mosaic_0001>

<bundles_post_ra>
// kernel: tpu_custom_call.1
= control target key start
LH: loop header
LB: loop body
LE: loop exit
PB: predicated region body
PF: predicated region fallthrough
CT: control target
= control target key end

     0   :  { %v2066_v0 = vmov 0   ;;  %vm579_vm0 = vcmask 154624   ;;  %vm676_vm1 = vcmask 1040384   ;;  %vm677_vm2 = vcmask 1041408   ;;  %s2948_s1 = inlined_call_operand.vmem [shape: bf16[147,64], index: 1, kind: input, shape index: {}]   ;;  %s2949_s0 = inlined_call_operand.vmem [shape: bf16[512,147], index: 0, kind: input, shape index: {}]   ;;  %s2950_s2 = inlined_call_operand.vmem [shape: f32[1,64], index: 2, kind: input, shape index: {}]   ;;  %s2951_s3 = inlined_call_operand.vmem [shape: f32[1,64], index: 3, kind: input, shape index: {}]   ;;  %s2952_s4 = inlined_call_operand.vmem [shape: bf16[512,64], index: 4, kind: output, shape index: {}]  }
   0x1   :  { %683 = vmatprep.subr.bf16.mxu0 %v2066_v0  ;;  %1935 = vmatprep.subr.bf16.mxu1 %v2066_v0  ;;  %v1958_v1 = vld [vmem:[%s2948_s1] sm:$0xff]   ;;  %v1959_v2 = vld [vmem:[%s2948_s1 + $0x8] sm:$0xff]   ;;  %v1960_v3 = vld [vmem:[%s2948_s1 + $0x10] sm:$0xff]   ;;  %v2067_v11 = vmov 65535   ;;  %vm22_vm3 = vcmask 523264   ;;  %v2068_v17 = vmov 0.0  }
   0x2   :  { %684 = vmatpush1.bf16.msra.mxu0 %v1958_v1  ;;  %1945 = vmatpush1.bf16.msra.mxu1 %v1958_v1  ;;  %v1961_v4 = vld [vmem:[%s2948_s1 + $0x18] sm:$0xff]   ;;  %v1970_v5 = vld [vmem:[%s2949_s0 + $0x4] ss:$8 sps:$4 sm:$0xff]   ;;  %v1964_v9 = vld [vmem:[%s2948_s1 + $0x30] sm:$0xff]   ;;  %v678_v12 = vsel %vm676_vm1, 4294967295, %v2067_v11  ;;  %23 = vst.msk [vmem:[#allocation2] sm:$0xff] %vm22_vm3, %v2068_v17 }
   0x3   :  { %685 = vmatprep.subr.bf16.mxu0 %v2066_v0  ;;  %1936 = vmatprep.subr.bf16.mxu1 %v2066_v0  ;;  %v1973_v6 = vld [vmem:[%s2949_s0 + $0x104] ss:$8 sps:$4 sm:$0xff]   ;;  %v1965_v10 = vld [vmem:[%s2948_s1 + $0x38] sm:$0xff]   ;;  %v1967_v14 = vld [vmem:[%s2948_s1 + $0x48] ss:$0 sps:$4 sm:$0x33]  }
   0x4   :  { %1773 = vmatprep.mubr.msk.bf16.mxu0 %vm579_vm0, %v1970_v5  ;;  %v1962_v7 = vld [vmem:[%s2948_s1 + $0x20] sm:$0xff]   ;;  %1789 = vmatprep.mubr.msk.bf16.mxu1 %vm579_vm0, %v1973_v6  ;;  %v1963_v8 = vld [vmem:[%s2948_s1 + $0x28] sm:$0xff]   ;;  %v679_v15 = vsel %vm677_vm2, %v678_v12, 0  ;;  %24 = vst.msk [vmem:[#allocation2 + $0x8] sm:$0xff] %vm22_vm3, %v2068_v17  ;;  %25 = vst.msk [vmem:[#allocation2 + $0x10] sm:$0xff] %vm22_vm3, %v2068_v17  ;;  %vm1630_vm4 = vcmask 519168  }
   0x5   :  { %v1966_v13 = vld [vmem:[%s2948_s1 + $0x40] sm:$0xff]   ;;  %v2132_v16 = vand.u32 %v1967_v14, %v679_v15  ;;  %26 = vst.msk [vmem:[#allocation2 + $0x18] sm:$0xff] %vm22_vm3, %v2068_v17  ;;  %27 = vst.msk [vmem:[#allocation2 + $0x20] sm:$0xff] %vm22_vm3, %v2068_v17  ;;  %v1974_v20 = vld [vmem:[%s2949_s0 + $0x14] ss:$8 sps:$4 sm:$0xff]  }
   0x6   :  { %686 = vmatpush1.bf16.msra.mxu0 %v1959_v2  ;;  %1946 = vmatpush1.bf16.msra.mxu1 %v1959_v2  ;;  %28 = vst.msk [vmem:[#allocation2 + $0x28] sm:$0xff] %vm22_vm3, %v2068_v17  ;;  %29 = vst.msk [vmem:[#allocation2 + $0x30] sm:$0xff] %vm22_vm3, %v2068_v17  ;;  %v1968_v18 = vld [vmem:[%s2949_s0] ss:$8 sps:$4 sm:$0xff]   ;;  %v1976_v21 = vld [vmem:[%s2949_s0 + $0x114] ss:$8 sps:$4 sm:$0xff]  }
   0x7   :  { %687 = vmatprep.subr.bf16.mxu0 %v2066_v0  ;;  %1937 = vmatprep.subr.bf16.mxu1 %v2066_v0  ;;  %30 = vst.msk [vmem:[#allocation2 + $0x38] sm:$0xff] %vm22_vm3, %v2068_v17  ;;  %31 = vst.msk [vmem:[#allocation2 + $0x40] sm:$0xff] %vm22_vm3, %v2068_v17  ;;  %v1971_v19 = vld [vmem:[%s2949_s0 + $0x100] ss:$8 sps:$4 sm:$0xff]   ;;  %v1978_v22 = vld [vmem:[%s2949_s0 + $0x10] ss:$8 sps:$4 sm:$0xff]  }
   0x8   :  { %32 = vst.msk [vmem:[#allocation2 + $0x48] sm:$0xff] %vm22_vm3, %v2068_v17  ;;  %33 = vst.msk [vmem:[#allocation2 + $0x50] sm:$0xff] %vm22_vm3, %v2068_v17  ;;  %v1979_v23 = vld [vmem:[%s2949_s0 + $0x110] ss:$8 sps:$4 sm:$0xff]   ;;  %v1980_v24 = vld [vmem:[%s2949_s0 + $0x24] ss:$8 sps:$4 sm:$0xff]  }
   0x9   :  { %34 = vst.msk [vmem:[#allocation2 + $0x58] sm:$0xff] %vm22_vm3, %v2068_v17  ;;  %35 = vst.msk [vmem:[#allocation2 + $0x60] sm:$0xff] %vm22_vm3, %v2068_v17  ;;  %v1982_v25 = vld [vmem:[%s2949_s0 + $0x124] ss:$8 sps:$4 sm:$0xff]   ;;  %v1984_v26 = vld [vmem:[%s2949_s0 + $0x20] ss:$8 sps:$4 sm:$0xff]  }
   0xa   :  { %688 = vmatpush1.bf16.msra.mxu0 %v1960_v3  ;;  %1947 = vmatpush1.bf16.msra.mxu1 %v1960_v3  ;;  %36 = vst.msk [vmem:[#allocation2 + $0x68] sm:$0xff] %vm22_vm3, %v2068_v17  ;;  %37 = vst.msk [vmem:[#allocation2 + $0x70] sm:$0xff] %vm22_vm3, %v2068_v17  ;;  %v1985_v27 = vld [vmem:[%s2949_s0 + $0x120] ss:$8 sps:$4 sm:$0xff]   ;;  %v1986_v28 = vld [vmem:[%s2949_s0 + $0x34] ss:$8 sps:$4 sm:$0xff]  }
   0xb   :  { %689 = vmatprep.subr.bf16.mxu0 %v2066_v0  ;;  %1938 = vmatprep.subr.bf16.mxu1 %v2066_v0  ;;  %38 = vst.msk [vmem:[#allocation2 + $0x78] sm:$0xff] %vm22_vm3, %v2068_v17  ;;  %39 = vst.msk [vmem:[#allocation2 + $0x80] sm:$0xff] %vm22_vm3, %v2068_v17  ;;  %v1988_v29 = vld [vmem:[%s2949_s0 + $0x134] ss:$8 sps:$4 sm:$0xff]   ;;  %v1990_v30 = vld [vmem:[%s2949_s0 + $0x30] ss:$8 sps:$4 sm:$0xff]  }
   0xc   :  { %40 = vst.msk [vmem:[#allocation2 + $0x88] sm:$0xff] %vm22_vm3, %v2068_v17  ;;  %41 = vst.msk [vmem:[#allocation2 + $0x90] sm:$0xff] %vm22_vm3, %v2068_v17  ;;  %v1991_v31 = vld [vmem:[%s2949_s0 + $0x130] ss:$8 sps:$4 sm:$0xff]   ;;  %v1992_v32 = vld [vmem:[%s2949_s0 + $0x44] ss:$8 sps:$4 sm:$0xff]  }
   0xd   :  { %42 = vst.msk [vmem:[#allocation2 + $0x98] sm:$0xff] %vm22_vm3, %v2068_v17  ;;  %43 = vst.msk [vmem:[#allocation2 + $0xa0] sm:$0xff] %vm22_vm3, %v2068_v17  ;;  %v1994_v33 = vld [vmem:[%s2949_s0 + $0x144] ss:$8 sps:$4 sm:$0xff]   ;;  %v1996_v34 = vld [vmem:[%s2949_s0 + $0x40] ss:$8 sps:$4 sm:$0xff]  }
   0xe   :  { %690 = vmatpush1.bf16.msra.mxu0 %v1961_v4  ;;  %1948 = vmatpush1.bf16.msra.mxu1 %v1961_v4  ;;  %44 = vst.msk [vmem:[#allocation2 + $0xa8] sm:$0xff] %vm22_vm3, %v2068_v17  ;;  %45 = vst.msk [vmem:[#allocation2 + $0xb0] sm:$0xff] %vm22_vm3, %v2068_v17  ;;  %v1997_v35 = vld [vmem:[%s2949_s0 + $0x140] ss:$8 sps:$4 sm:$0xff]   ;;  %v1998_v36 = vld [vmem:[%s2949_s0 + $0x54] ss:$8 sps:$4 sm:$0xff]  }
   0xf   :  { %691 = vmatprep.subr.bf16.mxu0 %v2066_v0  ;;  %1939 = vmatprep.subr.bf16.mxu1 %v2066_v0  ;;  %46 = vst.msk [vmem:[#allocation2 + $0xb8] sm:$0xff] %vm22_vm3, %v2068_v17  ;;  %47 = vst.msk [vmem:[#allocation2 + $0xc0] sm:$0xff] %vm22_vm3, %v2068_v17  ;;  %v2000_v37 = vld [vmem:[%s2949_s0 + $0x154] ss:$8 sps:$4 sm:$0xff]   ;;  %v2002_v38 = vld [vmem:[%s2949_s0 + $0x50] ss:$8 sps:$4 sm:$0xff]  }
  0x10   :  { %48 = vst.msk [vmem:[#allocation2 + $0xc8] sm:$0xff] %vm22_vm3, %v2068_v17  ;;  %49 = vst.msk [vmem:[#allocation2 + $0xd0] sm:$0xff] %vm22_vm3, %v2068_v17  ;;  %v2003_v39 = vld [vmem:[%s2949_s0 + $0x150] ss:$8 sps:$4 sm:$0xff]   ;;  %v2004_v40 = vld [vmem:[%s2949_s0 + $0x64] ss:$8 sps:$4 sm:$0xff]  }
  0x11   :  { %50 = vst.msk [vmem:[#allocation2 + $0xd8] sm:$0xff] %vm22_vm3, %v2068_v17  ;;  %51 = vst.msk [vmem:[#allocation2 + $0xe0] sm:$0xff] %vm22_vm3, %v2068_v17  ;;  %v2006_v41 = vld [vmem:[%s2949_s0 + $0x164] ss:$8 sps:$4 sm:$0xff]   ;;  %v2008_v42 = vld [vmem:[%s2949_s0 + $0x60] ss:$8 sps:$4 sm:$0xff]  }
  0x12   :  { %692 = vmatpush1.bf16.msra.mxu0 %v1962_v7  ;;  %1949 = vmatpush1.bf16.msra.mxu1 %v1962_v7  ;;  %52 = vst.msk [vmem:[#allocation2 + $0xe8] sm:$0xff] %vm22_vm3, %v2068_v17  ;;  %53 = vst.msk [vmem:[#allocation2 + $0xf0] sm:$0xff] %vm22_vm3, %v2068_v17  ;;  %v2009_v43 = vld [vmem:[%s2949_s0 + $0x160] ss:$8 sps:$4 sm:$0xff]   ;;  %v2010_v44 = vld [vmem:[%s2949_s0 + $0x74] ss:$8 sps:$4 sm:$0xff]  }
  0x13   :  { %693 = vmatprep.subr.bf16.mxu0 %v2066_v0  ;;  %1940 = vmatprep.subr.bf16.mxu1 %v2066_v0  ;;  %54 = vst.msk [vmem:[#allocation2 + $0xf8] sm:$0xff] %vm22_vm3, %v2068_v17  ;;  %55 = vst.msk [vmem:[#allocation2 + $0x100] sm:$0xff] %vm22_vm3, %v2068_v17  ;;  %v2012_v45 = vld [vmem:[%s2949_s0 + $0x174] ss:$8 sps:$4 sm:$0xff]   ;;  %v2014_v46 = vld [vmem:[%s2949_s0 + $0x70] ss:$8 sps:$4 sm:$0xff]  }
  0x14   :  { %56 = vst.msk [vmem:[#allocation2 + $0x108] sm:$0xff] %vm22_vm3, %v2068_v17  ;;  %57 = vst.msk [vmem:[#allocation2 + $0x110] sm:$0xff] %vm22_vm3, %v2068_v17  ;;  %v2015_v47 = vld [vmem:[%s2949_s0 + $0x170] ss:$8 sps:$4 sm:$0xff]   ;;  %v2016_v48 = vld [vmem:[%s2949_s0 + $0x84] ss:$8 sps:$4 sm:$0xff]  }
  0x15   :  { %58 = vst.msk [vmem:[#allocation2 + $0x118] sm:$0xff] %vm22_vm3, %v2068_v17  ;;  %59 = vst.msk [vmem:[#allocation2 + $0x120] sm:$0xff] %vm22_vm3, %v2068_v17  ;;  %v2018_v49 = vld [vmem:[%s2949_s0 + $0x184] ss:$8 sps:$4 sm:$0xff]   ;;  %v2020_v50 = vld [vmem:[%s2949_s0 + $0x80] ss:$8 sps:$4 sm:$0xff]  }
  0x16   :  { %694 = vmatpush1.bf16.msra.mxu0 %v1963_v8  ;;  %1950 = vmatpush1.bf16.msra.mxu1 %v1963_v8  ;;  %60 = vst.msk [vmem:[#allocation2 + $0x128] sm:$0xff] %vm22_vm3, %v2068_v17  ;;  %61 = vst.msk [vmem:[#allocation2 + $0x130] sm:$0xff] %vm22_vm3, %v2068_v17  ;;  %v2021_v51 = vld [vmem:[%s2949_s0 + $0x180] ss:$8 sps:$4 sm:$0xff]   ;;  %v2022_v52 = vld [vmem:[%s2949_s0 + $0x94] ss:$8 sps:$4 sm:$0xff]  }
  0x17   :  { %695 = vmatprep.subr.bf16.mxu0 %v2066_v0  ;;  %1941 = vmatprep.subr.bf16.mxu1 %v2066_v0  ;;  %62 = vst.msk [vmem:[#allocation2 + $0x138] sm:$0xff] %vm22_vm3, %v2068_v17  ;;  %63 = vst.msk [vmem:[#allocation2 + $0x140] sm:$0xff] %vm22_vm3, %v2068_v17  ;;  %v2024_v53 = vld [vmem:[%s2949_s0 + $0x194] ss:$8 sps:$4 sm:$0xff]   ;;  %v2026_v54 = vld [vmem:[%s2949_s0 + $0x90] ss:$8 sps:$4 sm:$0xff]  }
  0x18   :  { %64 = vst.msk [vmem:[#allocation2 + $0x148] sm:$0xff] %vm22_vm3, %v2068_v17  ;;  %65 = vst.msk [vmem:[#allocation2 + $0x150] sm:$0xff] %vm22_vm3, %v2068_v17  ;;  %v2027_v55 = vld [vmem:[%s2949_s0 + $0x190] ss:$8 sps:$4 sm:$0xff]   ;;  %v2028_v56 = vld [vmem:[%s2949_s0 + $0xa4] ss:$8 sps:$4 sm:$0xff]  }
  0x19   :  { %66 = vst.msk [vmem:[#allocation2 + $0x158] sm:$0xff] %vm22_vm3, %v2068_v17  ;;  %67 = vst.msk [vmem:[#allocation2 + $0x160] sm:$0xff] %vm22_vm3, %v2068_v17  ;;  %v2030_v57 = vld [vmem:[%s2949_s0 + $0x1a4] ss:$8 sps:$4 sm:$0xff]   ;;  %v2032_v58 = vld [vmem:[%s2949_s0 + $0xa0] ss:$8 sps:$4 sm:$0xff]  }
  0x1a   :  { %696 = vmatpush1.bf16.msra.mxu0 %v1964_v9  ;;  %1951 = vmatpush1.bf16.msra.mxu1 %v1964_v9  ;;  %68 = vst.msk [vmem:[#allocation2 + $0x168] sm:$0xff] %vm22_vm3, %v2068_v17  ;;  %69 = vst.msk [vmem:[#allocation2 + $0x170] sm:$0xff] %vm22_vm3, %v2068_v17  ;;  %v2033_v59 = vld [vmem:[%s2949_s0 + $0x1a0] ss:$8 sps:$4 sm:$0xff]   ;;  %v2034_v60 = vld [vmem:[%s2949_s0 + $0xb4] ss:$8 sps:$4 sm:$0xff]  }
  0x1b   :  { %697 = vmatprep.subr.bf16.mxu0 %v2066_v0  ;;  %1942 = vmatprep.subr.bf16.mxu1 %v2066_v0  ;;  %70 = vst.msk [vmem:[#allocation2 + $0x178] sm:$0xff] %vm22_vm3, %v2068_v17  ;;  %71 = vst.msk [vmem:[#allocation2 + $0x180] sm:$0xff] %vm22_vm3, %v2068_v17  ;;  %v2036_v61 = vld [vmem:[%s2949_s0 + $0x1b4] ss:$8 sps:$4 sm:$0xff]   ;;  %v2038_v62 = vld [vmem:[%s2949_s0 + $0xb0] ss:$8 sps:$4 sm:$0xff]  }
  0x1c   :  { %72 = vst.msk [vmem:[#allocation2 + $0x188] sm:$0xff] %vm22_vm3, %v2068_v17  ;;  %73 = vst.msk [vmem:[#allocation2 + $0x190] sm:$0xff] %vm22_vm3, %v2068_v17  ;;  %v2039_v63 = vld [vmem:[%s2949_s0 + $0x1b0] ss:$8 sps:$4 sm:$0xff]   ;;  %v2042_v1 = vld [vmem:[%s2949_s0 + $0x1c4] ss:$8 sps:$4 sm:$0xff]  }
  0x1d   :  { %74 = vst.msk [vmem:[#allocation2 + $0x198] sm:$0xff] %vm22_vm3, %v2068_v17  ;;  %75 = vst.msk [vmem:[#allocation2 + $0x1a0] sm:$0xff] %vm22_vm3, %v2068_v17  ;;  %v2044_v2 = vld [vmem:[%s2949_s0 + $0xc0] ss:$8 sps:$4 sm:$0xff]   ;;  %v2046_v4 = vld [vmem:[%s2949_s0 + $0xd4] ss:$8 sps:$4 sm:$0xff]  }
  0x1e   :  { %698 = vmatpush1.bf16.msra.mxu0 %v1965_v10  ;;  %1952 = vmatpush1.bf16.msra.mxu1 %v1965_v10  ;;  %76 = vst.msk [vmem:[#allocation2 + $0x1a8] sm:$0xff] %vm22_vm3, %v2068_v17  ;;  %77 = vst.msk [vmem:[#allocation2 + $0x1b0] sm:$0xff] %vm22_vm3, %v2068_v17  ;;  %v2045_v3 = vld [vmem:[%s2949_s0 + $0x1c0] ss:$8 sps:$4 sm:$0xff]   ;;  %v2048_v5 = vld [vmem:[%s2949_s0 + $0x1d4] ss:$8 sps:$4 sm:$0xff]  }
  0x1f   :  { %699 = vmatprep.subr.bf16.mxu0 %v2066_v0  ;;  %1943 = vmatprep.subr.bf16.mxu1 %v2066_v0  ;;  %78 = vst.msk [vmem:[#allocation2 + $0x1b8] sm:$0xff] %vm22_vm3, %v2068_v17  ;;  %79 = vst.msk [vmem:[#allocation2 + $0x1c0] sm:$0xff] %vm22_vm3, %v2068_v17  ;;  %v2050_v6 = vld [vmem:[%s2949_s0 + $0xd0] ss:$8 sps:$4 sm:$0xff]   ;;  %v2052_v8 = vld [vmem:[%s2949_s0 + $0xe4] ss:$8 sps:$4 sm:$0xff]  }
  0x20   :  { %80 = vst.msk [vmem:[#allocation2 + $0x1c8] sm:$0xff] %vm22_vm3, %v2068_v17  ;;  %81 = vst.msk [vmem:[#allocation2 + $0x1d0] sm:$0xff] %vm22_vm3, %v2068_v17  ;;  %v2051_v7 = vld [vmem:[%s2949_s0 + $0x1d0] ss:$8 sps:$4 sm:$0xff]   ;;  %v2054_v9 = vld [vmem:[%s2949_s0 + $0x1e4] ss:$8 sps:$4 sm:$0xff]  }
  0x21   :  { %82 = vst.msk [vmem:[#allocation2 + $0x1d8] sm:$0xff] %vm22_vm3, %v2068_v17  ;;  %83 = vst.msk [vmem:[#allocation2 + $0x1e0] sm:$0xff] %vm22_vm3, %v2068_v17  ;;  %v2056_v10 = vld [vmem:[%s2949_s0 + $0xe0] ss:$8 sps:$4 sm:$0xff]   ;;  %v2058_v12 = vld [vmem:[%s2949_s0 + $0xf4] ss:$8 sps:$4 sm:$0xff]  }
  0x22   :  { %700 = vmatpush1.bf16.msra.mxu0 %v1966_v13  ;;  %1953 = vmatpush1.bf16.msra.mxu1 %v1966_v13  ;;  %84 = vst.msk [vmem:[#allocation2 + $0x1e8] sm:$0xff] %vm22_vm3, %v2068_v17  ;;  %85 = vst.msk [vmem:[#allocation2 + $0x1f0] sm:$0xff] %vm22_vm3, %v2068_v17  ;;  %v2057_v11 = vld [vmem:[%s2949_s0 + $0x1e0] ss:$8 sps:$4 sm:$0xff]   ;;  %v2060_v13 = vld [vmem:[%s2949_s0 + $0x1f4] ss:$8 sps:$4 sm:$0xff]  }
  0x23   :  { %701 = vmatprep.subr.bf16.mxu0 %v2066_v0  ;;  %1944 = vmatprep.subr.bf16.mxu1 %v2066_v0  ;;  %86 = vst.msk [vmem:[#allocation2 + $0x1f8] sm:$0xff] %vm22_vm3, %v2068_v17  ;;  %v2040_v0 = vld [vmem:[%s2949_s0 + $0xc4] ss:$8 sps:$4 sm:$0xff]   ;;  %v2062_v14 = vld [vmem:[%s2949_s0 + $0xf0] ss:$8 sps:$4 sm:$0xff]  }
  0x24   :  { %v2063_v15 = vld [vmem:[%s2949_s0 + $0x1f0] ss:$8 sps:$4 sm:$0xff]   ;;  %v119_v17 = vld [vmem:[#allocation2 + $0x100] sm:$0xff] }
  0x26   :  { %702 = vmatpush1.bf16.msra.mxu0 %v2132_v16  ;;  %1954 = vmatpush1.bf16.msra.mxu1 %v2132_v16  ;;  %v87_v16 = vld [vmem:[#allocation2] sm:$0xff] }
  0x29   :  { %716 = vmatmul.mubr.bf16.vlgmr.msra.gmra.mrb[0].mxu0 %v1968_v18  ;;  %844 = vmatmul.mubr.bf16.vlgmr.msra.gmra.mrb[0].mxu1 %v1971_v19 }
  0x2a   :  { %1774 = vmatprep.mubr.msk.bf16.mxu0 %vm579_vm0, %v1974_v20  ;;  %1790 = vmatprep.mubr.msk.bf16.mxu1 %vm579_vm0, %v1976_v21  ;;  %v88_v20 = vld [vmem:[#allocation2 + $0x8] sm:$0xff] }
  0x2b   :  { %v120_v21 = vld [vmem:[#allocation2 + $0x108] sm:$0xff] }
  0x31   :  { %724 = vmatmul.mubr.bf16.gmra.mrb[4].mxu0 %v1978_v22  ;;  %852 = vmatmul.mubr.bf16.gmra.mrb[4].mxu1 %v1979_v23 }
  0x32   :  { %1775 = vmatprep.mubr.msk.bf16.mxu0 %vm579_vm0, %v1980_v24  ;;  %1791 = vmatprep.mubr.msk.bf16.mxu1 %vm579_vm0, %v1982_v25 }
  0x39   :  { %732 = vmatmul.mubr.bf16.gmra.mrb[8].mxu0 %v1984_v26  ;;  %860 = vmatmul.mubr.bf16.gmra.mrb[8].mxu1 %v1985_v27 }
  0x3a   :  { %1776 = vmatprep.mubr.msk.bf16.mxu0 %vm579_vm0, %v1986_v28  ;;  %1792 = vmatprep.mubr.msk.bf16.mxu1 %vm579_vm0, %v1988_v29 }
  0x41   :  { %740 = vmatmul.mubr.bf16.gmra.mrb[12].mxu0 %v1990_v30  ;;  %868 = vmatmul.mubr.bf16.gmra.mrb[12].mxu1 %v1991_v31 }
  0x42   :  { %1777 = vmatprep.mubr.msk.bf16.mxu0 %vm579_vm0, %v1992_v32  ;;  %1793 = vmatprep.mubr.msk.bf16.mxu1 %vm579_vm0, %v1994_v33  ;;  %v89_v32 = vld [vmem:[#allocation2 + $0x10] sm:$0xff] }
  0x43   :  { %v121_v33 = vld [vmem:[#allocation2 + $0x110] sm:$0xff] }
  0x49   :  { %748 = vmatmul.mubr.bf16.gmra.mrb[16].mxu0 %v1996_v34  ;;  %876 = vmatmul.mubr.bf16.gmra.mrb[16].mxu1 %v1997_v35  ;;  %v2487_v34 = vld [vmem:[%s2950_s2] ss:$0 sm:$0xff] }
  0x4a   :  { %1778 = vmatprep.mubr.msk.bf16.mxu0 %vm579_vm0, %v1998_v36  ;;  %1794 = vmatprep.mubr.msk.bf16.mxu1 %vm579_vm0, %v2000_v37  ;;  %v90_v37 = vld [vmem:[#allocation2 + $0x18] sm:$0xff] }
  0x51   :  { %756 = vmatmul.mubr.bf16.gmra.mrb[20].mxu0 %v2002_v38  ;;  %884 = vmatmul.mubr.bf16.gmra.mrb[20].mxu1 %v2003_v39  ;;  %v122_v38 = vld [vmem:[#allocation2 + $0x118] sm:$0xff] }
  0x52   :  { %1779 = vmatprep.mubr.msk.bf16.mxu0 %vm579_vm0, %v2004_v40  ;;  %1795 = vmatprep.mubr.msk.bf16.mxu1 %vm579_vm0, %v2006_v41 }
  0x59   :  { %764 = vmatmul.mubr.bf16.gmra.mrb[24].mxu0 %v2008_v42  ;;  %892 = vmatmul.mubr.bf16.gmra.mrb[24].mxu1 %v2009_v43 }
  0x5a   :  { %1780 = vmatprep.mubr.msk.bf16.mxu0 %vm579_vm0, %v2010_v44  ;;  %1796 = vmatprep.mubr.msk.bf16.mxu1 %vm579_vm0, %v2012_v45  ;;  %v2492_v44 = vld [vmem:[%s2951_s3] ss:$0 sm:$0xff] }
  0x61   :  { %772 = vmatmul.mubr.bf16.gmra.mrb[28].mxu0 %v2014_v46  ;;  %900 = vmatmul.mubr.bf16.gmra.mrb[28].mxu1 %v2015_v47 }
  0x62   :  { %1781 = vmatprep.mubr.msk.bf16.mxu0 %vm579_vm0, %v2016_v48  ;;  %1797 = vmatprep.mubr.msk.bf16.mxu1 %vm579_vm0, %v2018_v49 }
  0x69   :  { %780 = vmatmul.mubr.bf16.gmra.mrb[32].mxu0 %v2020_v50  ;;  %908 = vmatmul.mubr.bf16.gmra.mrb[32].mxu1 %v2021_v51 }
  0x6a   :  { %1782 = vmatprep.mubr.msk.bf16.mxu0 %vm579_vm0, %v2022_v52  ;;  %1798 = vmatprep.mubr.msk.bf16.mxu1 %vm579_vm0, %v2024_v53 }
  0x71   :  { %788 = vmatmul.mubr.bf16.gmra.mrb[36].mxu0 %v2026_v54  ;;  %916 = vmatmul.mubr.bf16.gmra.mrb[36].mxu1 %v2027_v55 }
  0x72   :  { %1783 = vmatprep.mubr.msk.bf16.mxu0 %vm579_vm0, %v2028_v56  ;;  %1799 = vmatprep.mubr.msk.bf16.mxu1 %vm579_vm0, %v2030_v57 }
  0x79   :  { %796 = vmatmul.mubr.bf16.gmra.mrb[40].mxu0 %v2032_v58  ;;  %924 = vmatmul.mubr.bf16.gmra.mrb[40].mxu1 %v2033_v59 }
  0x7a   :  { %1784 = vmatprep.mubr.msk.bf16.mxu0 %vm579_vm0, %v2034_v60  ;;  %1800 = vmatprep.mubr.msk.bf16.mxu1 %vm579_vm0, %v2036_v61 }
  0x81   :  { %804 = vmatmul.mubr.bf16.gmra.mrb[44].mxu0 %v2038_v62  ;;  %932 = vmatmul.mubr.bf16.gmra.mrb[44].mxu1 %v2039_v63 }
  0x82   :  { %1785 = vmatprep.mubr.msk.bf16.mxu0 %vm579_vm0, %v2040_v0  ;;  %1801 = vmatprep.mubr.msk.bf16.mxu1 %vm579_vm0, %v2042_v1  ;;  %v91_v0 = vld [vmem:[#allocation2 + $0x20] sm:$0xff] }
  0x83   :  { %v123_v1 = vld [vmem:[#allocation2 + $0x120] sm:$0xff] }
  0x89   :  { %812 = vmatmul.mubr.bf16.gmra.mrb[48].mxu0 %v2044_v2  ;;  %940 = vmatmul.mubr.bf16.gmra.mrb[48].mxu1 %v2045_v3 }
  0x8a   :  { %1786 = vmatprep.mubr.msk.bf16.mxu0 %vm579_vm0, %v2046_v4  ;;  %1802 = vmatprep.mubr.msk.bf16.mxu1 %vm579_vm0, %v2048_v5 }
  0x91   :  { %820 = vmatmul.mubr.bf16.gmra.mrb[52].mxu0 %v2050_v6  ;;  %948 = vmatmul.mubr.bf16.gmra.mrb[52].mxu1 %v2051_v7 }
  0x92   :  { %1787 = vmatprep.mubr.msk.bf16.mxu0 %vm579_vm0, %v2052_v8  ;;  %1803 = vmatprep.mubr.msk.bf16.mxu1 %vm579_vm0, %v2054_v9 }
  0x99   :  { %828 = vmatmul.mubr.bf16.gmra.mrb[56].mxu0 %v2056_v10  ;;  %956 = vmatmul.mubr.bf16.gmra.mrb[56].mxu1 %v2057_v11  ;;  %v92_v10 = vld [vmem:[#allocation2 + $0x28] sm:$0xff] }
  0x9a   :  { %1788 = vmatprep.mubr.msk.bf16.mxu0 %vm579_vm0, %v2058_v12  ;;  %1804 = vmatprep.mubr.msk.bf16.mxu1 %vm579_vm0, %v2060_v13  ;;  %v124_v11 = vld [vmem:[#allocation2 + $0x128] sm:$0xff] }
  0xa1   :  { %836 = vmatmul.mubr.bf16.gmra.mrb[60].mxu0 %v2062_v14  ;;  %964 = vmatmul.mubr.bf16.gmra.mrb[60].mxu1 %v2063_v15 }
  0xfc   :  { %v717_v18 = vpop.f32.mrb[0].mxu0  ;;  %v845_v19 = vpop.f32.mrb[0].mxu1 }
  0xfd   :  { %v972_v22 = vadd.f32 %v717_v18, %v87_v16  ;;  %v1004_v23 = vadd.f32 %v845_v19, %v119_v17  ;;  %v719_v24 = vpop.f32.mrb[1].mxu0  ;;  %v847_v25 = vpop.f32.mrb[1].mxu1 }
  0xfe   :  { %v720_v26 = vpop.f32.mrb[2].mxu0  ;;  %v848_v27 = vpop.f32.mrb[2].mxu1 }
  0xff   :  { %1037 = vst.msk [vmem:[#allocation2] sm:$0xff] %vm22_vm3, %v972_v22  ;;  %1069 = vst.msk [vmem:[#allocation2 + $0x100] sm:$0xff] %vm22_vm3, %v1004_v23  ;;  %v973_v28 = vadd.f32 %v720_v26, %v88_v20  ;;  %v1005_v29 = vadd.f32 %v848_v27, %v120_v21  ;;  %v722_v30 = vpop.f32.mrb[3].mxu0  ;;  %v850_v31 = vpop.f32.mrb[3].mxu1 }
 0x101   :  { %1038 = vst.msk [vmem:[#allocation2 + $0x8] sm:$0xff] %vm22_vm3, %v973_v28  ;;  %1070 = vst.msk [vmem:[#allocation2 + $0x108] sm:$0xff] %vm22_vm3, %v1005_v29 }
 0x104   :  { %v725_v35 = vpop.f32.mrb[4].mxu0  ;;  %v853_v36 = vpop.f32.mrb[4].mxu1 }
 0x105   :  { %v974_v39 = vadd.f32 %v725_v35, %v89_v32  ;;  %v1006_v40 = vadd.f32 %v853_v36, %v121_v33  ;;  %v727_v41 = vpop.f32.mrb[5].mxu0  ;;  %v855_v42 = vpop.f32.mrb[5].mxu1 }
 0x106   :  { %v1104_v43 = vld [vmem:[#allocation2] sm:$0xff]  ;;  %v728_v46 = vpop.f32.mrb[6].mxu0  ;;  %v856_v47 = vpop.f32.mrb[6].mxu1  ;;  %v94_v41 = vld [vmem:[#allocation2 + $0x38] sm:$0xff] }
 0x107   :  { %v1136_v45 = vld [vmem:[#allocation2 + $0x100] sm:$0xff]  ;;  %v1175_v48 = vmul.f32 %v2487_v34, %v1104_v43  ;;  %1039 = vst.msk [vmem:[#allocation2 + $0x10] sm:$0xff] %vm22_vm3, %v974_v39  ;;  %1071 = vst.msk [vmem:[#allocation2 + $0x110] sm:$0xff] %vm22_vm3, %v1006_v40  ;;  %v975_v50 = vadd.f32 %v728_v46, %v90_v37  ;;  %v1007_v51 = vadd.f32 %v856_v47, %v122_v38  ;;  %v730_v52 = vpop.f32.mrb[7].mxu0  ;;  %v858_v53 = vpop.f32.mrb[7].mxu1  ;;  %v93_v37 = vld [vmem:[#allocation2 + $0x30] sm:$0xff] }
 0x108   :  { %v1207_v49 = vmul.f32 %v2487_v34, %v1136_v45  ;;  %v1105_v54 = vld [vmem:[#allocation2 + $0x8] sm:$0xff]  ;;  %v125_v38 = vld [vmem:[#allocation2 + $0x130] sm:$0xff]  ;;  %v126_v42 = vld [vmem:[#allocation2 + $0x138] sm:$0xff] }
 0x109   :  { %v1137_v55 = vld [vmem:[#allocation2 + $0x108] sm:$0xff]  ;;  %v1246_v56 = vadd.f32 %v2492_v44, %v1175_v48  ;;  %v1176_v58 = vmul.f32 %v2487_v34, %v1105_v54  ;;  %1040 = vst.msk [vmem:[#allocation2 + $0x18] sm:$0xff] %vm22_vm3, %v975_v50  ;;  %1072 = vst.msk [vmem:[#allocation2 + $0x118] sm:$0xff] %vm22_vm3, %v1007_v51 }
 0x10a   :  { %v1278_v57 = vadd.f32 %v2492_v44, %v1207_v49  ;;  %v1208_v59 = vmul.f32 %v2487_v34, %v1137_v55 }
 0x10b   :  { %v1310_v60 = vmax.f32 %v1246_v56, 0.0  ;;  %v1247_v62 = vadd.f32 %v2492_v44, %v1176_v58 }
 0x10c   :  { %v1342_v61 = vmax.f32 %v1278_v57, 0.0  ;;  %v1279_v63 = vadd.f32 %v2492_v44, %v1208_v59  ;;  %v733_v2 = vpop.f32.mrb[8].mxu0  ;;  %v861_v3 = vpop.f32.mrb[8].mxu1 }
 0x10d   :  { %v1871_v4 = vpack.c.bf16 %v1310_v60, %v1310_v60  ;;  %v1311_v6 = vmax.f32 %v1247_v62, 0.0  ;;  %v735_v8 = vpop.f32.mrb[9].mxu0  ;;  %v863_v9 = vpop.f32.mrb[9].mxu1  ;;  %v976_v14 = vadd.f32 %v733_v2, %v91_v0  ;;  %v1008_v15 = vadd.f32 %v861_v3, %v123_v1 }
 0x10e   :  { %v1903_v5 = vpack.c.bf16 %v1342_v61, %v1342_v61  ;;  %v1343_v7 = vmax.f32 %v1279_v63, 0.0  ;;  %v1106_v12 = vld [vmem:[#allocation2 + $0x10] sm:$0xff]  ;;  %v736_v16 = vpop.f32.mrb[10].mxu0  ;;  %v864_v17 = vpop.f32.mrb[10].mxu1 }
 0x10f   :  { %v1138_v13 = vld [vmem:[#allocation2 + $0x110] sm:$0xff]  ;;  %1631 = vst.msk [vmem:[%s2952_s4] sm:$0xf] %vm1630_vm4, %v1871_v4  ;;  %v1872_v18 = vpack.c.bf16 %v1311_v6, %v1311_v6  ;;  %v1177_v20 = vmul.f32 %v2487_v34, %v1106_v12  ;;  %v738_v22 = vpop.f32.mrb[11].mxu0  ;;  %v866_v23 = vpop.f32.mrb[11].mxu1  ;;  %v977_v26 = vadd.f32 %v736_v16, %v92_v10  ;;  %v1009_v27 = vadd.f32 %v864_v17, %v124_v11  ;;  %v95_v6 = vld [vmem:[#allocation2 + $0x40] sm:$0xff] }
 0x110   :  { %1663 = vst.msk [vmem:[%s2952_s4 + $0x80] sm:$0xf] %vm1630_vm4, %v1903_v5  ;;  %v1904_v19 = vpack.c.bf16 %v1343_v7, %v1343_v7  ;;  %v1209_v21 = vmul.f32 %v2487_v34, %v1138_v13  ;;  %v1107_v24 = vld [vmem:[#allocation2 + $0x18] sm:$0xff]  ;;  %v127_v7 = vld [vmem:[#allocation2 + $0x140] sm:$0xff] }
 0x111   :  { %v1139_v25 = vld [vmem:[#allocation2 + $0x118] sm:$0xff]  ;;  %1041 = vst.msk [vmem:[#allocation2 + $0x20] sm:$0xff] %vm22_vm3, %v976_v14  ;;  %1073 = vst.msk [vmem:[#allocation2 + $0x120] sm:$0xff] %vm22_vm3, %v1008_v15  ;;  %v1248_v28 = vadd.f32 %v2492_v44, %v1177_v20  ;;  %v1178_v30 = vmul.f32 %v2487_v34, %v1107_v24  ;;  %v96_v14 = vld [vmem:[#allocation2 + $0x48] sm:$0xff] }
 0x112   :  { %1632 = vst.msk [vmem:[%s2952_s4 + $0x4] sm:$0xf] %vm1630_vm4, %v1872_v18  ;;  %1664 = vst.msk [vmem:[%s2952_s4 + $0x84] sm:$0xf] %vm1630_vm4, %v1904_v19  ;;  %v1280_v29 = vadd.f32 %v2492_v44, %v1209_v21  ;;  %v1210_v31 = vmul.f32 %v2487_v34, %v1139_v25  ;;  %v128_v15 = vld [vmem:[#allocation2 + $0x148] sm:$0xff] }
 0x113   :  { %1042 = vst.msk [vmem:[#allocation2 + $0x28] sm:$0xff] %vm22_vm3, %v977_v26  ;;  %1074 = vst.msk [vmem:[#allocation2 + $0x128] sm:$0xff] %vm22_vm3, %v1009_v27  ;;  %v1312_v32 = vmax.f32 %v1248_v28, 0.0  ;;  %v1249_v35 = vadd.f32 %v2492_v44, %v1178_v30 }
 0x114   :  { %v1344_v33 = vmax.f32 %v1280_v29, 0.0  ;;  %v1281_v36 = vadd.f32 %v2492_v44, %v1210_v31  ;;  %v741_v39 = vpop.f32.mrb[12].mxu0  ;;  %v869_v40 = vpop.f32.mrb[12].mxu1 }
 0x115   :  { %v1873_v43 = vpack.c.bf16 %v1312_v32, %v1312_v32  ;;  %v1313_v46 = vmax.f32 %v1249_v35, 0.0  ;;  %v743_v48 = vpop.f32.mrb[13].mxu0  ;;  %v871_v49 = vpop.f32.mrb[13].mxu1  ;;  %v978_v50 = vadd.f32 %v741_v39, %v93_v37  ;;  %v1010_v51 = vadd.f32 %v869_v40, %v125_v38 }
 0x116   :  { %v1905_v45 = vpack.c.bf16 %v1344_v33, %v1344_v33  ;;  %v1345_v47 = vmax.f32 %v1281_v36, 0.0  ;;  %v744_v52 = vpop.f32.mrb[14].mxu0  ;;  %v872_v53 = vpop.f32.mrb[14].mxu1 }
 0x117   :  { %1633 = vst.msk [vmem:[%s2952_s4 + $0x8] sm:$0xf] %vm1630_vm4, %v1873_v43  ;;  %v1874_v54 = vpack.c.bf16 %v1313_v46, %v1313_v46  ;;  %v979_v58 = vadd.f32 %v744_v52, %v94_v41  ;;  %v1011_v59 = vadd.f32 %v872_v53, %v126_v42  ;;  %v746_v60 = vpop.f32.mrb[15].mxu0  ;;  %v874_v61 = vpop.f32.mrb[15].mxu1  ;;  %v97_v43 = vld [vmem:[#allocation2 + $0x50] sm:$0xff] }
 0x118   :  { %1665 = vst.msk [vmem:[%s2952_s4 + $0x88] sm:$0xf] %vm1630_vm4, %v1905_v45  ;;  %v1906_v55 = vpack.c.bf16 %v1345_v47, %v1345_v47  ;;  %v1108_v56 = vld [vmem:[#allocation2 + $0x20] sm:$0xff]  ;;  %v129_v45 = vld [vmem:[#allocation2 + $0x150] sm:$0xff] }
 0x119   :  { %v1140_v57 = vld [vmem:[#allocation2 + $0x120] sm:$0xff]  ;;  %v1179_v62 = vmul.f32 %v2487_v34, %v1108_v56  ;;  %1043 = vst.msk [vmem:[#allocation2 + $0x30] sm:$0xff] %vm22_vm3, %v978_v50  ;;  %1075 = vst.msk [vmem:[#allocation2 + $0x130] sm:$0xff] %vm22_vm3, %v1010_v51 }
 0x11a   :  { %v1211_v63 = vmul.f32 %v2487_v34, %v1140_v57  ;;  %1634 = vst.msk [vmem:[%s2952_s4 + $0xc] sm:$0xf] %vm1630_vm4, %v1874_v54  ;;  %1666 = vst.msk [vmem:[%s2952_s4 + $0x8c] sm:$0xf] %vm1630_vm4, %v1906_v55  ;;  %v1109_v0 = vld [vmem:[#allocation2 + $0x28] sm:$0xff] }
 0x11b   :  { %v1141_v1 = vld [vmem:[#allocation2 + $0x128] sm:$0xff]  ;;  %1044 = vst.msk [vmem:[#allocation2 + $0x38] sm:$0xff] %vm22_vm3, %v979_v58  ;;  %1076 = vst.msk [vmem:[#allocation2 + $0x138] sm:$0xff] %vm22_vm3, %v1011_v59  ;;  %v1250_v2 = vadd.f32 %v2492_v44, %v1179_v62  ;;  %v1180_v4 = vmul.f32 %v2487_v34, %v1109_v0  ;;  %v98_v58 = vld [vmem:[#allocation2 + $0x58] sm:$0xff] }
 0x11c   :  { %v1282_v3 = vadd.f32 %v2492_v44, %v1211_v63  ;;  %v1212_v5 = vmul.f32 %v2487_v34, %v1141_v1  ;;  %v749_v12 = vpop.f32.mrb[16].mxu0  ;;  %v877_v13 = vpop.f32.mrb[16].mxu1  ;;  %v130_v59 = vld [vmem:[#allocation2 + $0x158] sm:$0xff] }
 0x11d   :  { %v1314_v8 = vmax.f32 %v1250_v2, 0.0  ;;  %v1251_v10 = vadd.f32 %v2492_v44, %v1180_v4  ;;  %v980_v16 = vadd.f32 %v749_v12, %v95_v6  ;;  %v1012_v17 = vadd.f32 %v877_v13, %v127_v7  ;;  %v751_v18 = vpop.f32.mrb[17].mxu0  ;;  %v879_v19 = vpop.f32.mrb[17].mxu1 }
 0x11e   :  { %v1346_v9 = vmax.f32 %v1282_v3, 0.0  ;;  %v1283_v11 = vadd.f32 %v2492_v44, %v1212_v5  ;;  %v752_v24 = vpop.f32.mrb[18].mxu0  ;;  %v880_v25 = vpop.f32.mrb[18].mxu1 }
 0x11f   :  { %v1875_v20 = vpack.c.bf16 %v1314_v8, %v1314_v8  ;;  %v1315_v22 = vmax.f32 %v1251_v10, 0.0  ;;  %1045 = vst.msk [vmem:[#allocation2 + $0x40] sm:$0xff] %vm22_vm3, %v980_v16  ;;  %1077 = vst.msk [vmem:[#allocation2 + $0x140] sm:$0xff] %vm22_vm3, %v1012_v17  ;;  %v981_v28 = vadd.f32 %v752_v24, %v96_v14  ;;  %v1013_v29 = vadd.f32 %v880_v25, %v128_v15  ;;  %v754_v30 = vpop.f32.mrb[19].mxu0  ;;  %v882_v31 = vpop.f32.mrb[19].mxu1 }
 0x120   :  { %v1907_v21 = vpack.c.bf16 %v1346_v9, %v1346_v9  ;;  %v1347_v23 = vmax.f32 %v1283_v11, 0.0  ;;  %v1110_v26 = vld [vmem:[#allocation2 + $0x30] sm:$0xff]  ;;  %v100_v30 = vld [vmem:[#allocation2 + $0x68] sm:$0xff] }
 0x121   :  { %v1142_v27 = vld [vmem:[#allocation2 + $0x130] sm:$0xff]  ;;  %1635 = vst.msk [vmem:[%s2952_s4 + $0x10] sm:$0xf] %vm1630_vm4, %v1875_v20  ;;  %v1876_v32 = vpack.c.bf16 %v1315_v22, %v1315_v22  ;;  %v1181_v35 = vmul.f32 %v2487_v34, %v1110_v26  ;;  %v99_v20 = vld [vmem:[#allocation2 + $0x60] sm:$0xff]  ;;  %v132_v31 = vld [vmem:[#allocation2 + $0x168] sm:$0xff] }
 0x122   :  { %1667 = vst.msk [vmem:[%s2952_s4 + $0x90] sm:$0xf] %vm1630_vm4, %v1907_v21  ;;  %v1908_v33 = vpack.c.bf16 %v1347_v23, %v1347_v23  ;;  %v1213_v36 = vmul.f32 %v2487_v34, %v1142_v27  ;;  %v1111_v37 = vld [vmem:[#allocation2 + $0x38] sm:$0xff]  ;;  %v131_v21 = vld [vmem:[#allocation2 + $0x160] sm:$0xff] }
 0x123   :  { %v1143_v38 = vld [vmem:[#allocation2 + $0x138] sm:$0xff]  ;;  %v1182_v39 = vmul.f32 %v2487_v34, %v1111_v37  ;;  %1046 = vst.msk [vmem:[#allocation2 + $0x48] sm:$0xff] %vm22_vm3, %v981_v28  ;;  %1078 = vst.msk [vmem:[#allocation2 + $0x148] sm:$0xff] %vm22_vm3, %v1013_v29  ;;  %v1252_v41 = vadd.f32 %v2492_v44, %v1181_v35 }
 0x124   :  { %v1214_v40 = vmul.f32 %v2487_v34, %v1143_v38  ;;  %1636 = vst.msk [vmem:[%s2952_s4 + $0x14] sm:$0xf] %vm1630_vm4, %v1876_v32  ;;  %1668 = vst.msk [vmem:[%s2952_s4 + $0x94] sm:$0xf] %vm1630_vm4, %v1908_v33  ;;  %v1284_v42 = vadd.f32 %v2492_v44, %v1213_v36  ;;  %v757_v50 = vpop.f32.mrb[20].mxu0  ;;  %v885_v51 = vpop.f32.mrb[20].mxu1 }
 0x125   :  { %v1253_v46 = vadd.f32 %v2492_v44, %v1182_v39  ;;  %v1316_v48 = vmax.f32 %v1252_v41, 0.0  ;;  %v982_v54 = vadd.f32 %v757_v50, %v97_v43  ;;  %v1014_v55 = vadd.f32 %v885_v51, %v129_v45  ;;  %v759_v56 = vpop.f32.mrb[21].mxu0  ;;  %v887_v57 = vpop.f32.mrb[21].mxu1 }
 0x126   :  { %v1285_v47 = vadd.f32 %v2492_v44, %v1214_v40  ;;  %v1348_v49 = vmax.f32 %v1284_v42, 0.0  ;;  %v1112_v62 = vld [vmem:[#allocation2 + $0x40] sm:$0xff]  ;;  %v760_v0 = vpop.f32.mrb[22].mxu0  ;;  %v888_v1 = vpop.f32.mrb[22].mxu1 }
 0x127   :  { %v1317_v52 = vmax.f32 %v1253_v46, 0.0  ;;  %v1877_v60 = vpack.c.bf16 %v1316_v48, %v1316_v48  ;;  %v1144_v63 = vld [vmem:[#allocation2 + $0x140] sm:$0xff]  ;;  %v1183_v4 = vmul.f32 %v2487_v34, %v1112_v62  ;;  %1047 = vst.msk [vmem:[#allocation2 + $0x50] sm:$0xff] %vm22_vm3, %v982_v54  ;;  %1079 = vst.msk [vmem:[#allocation2 + $0x150] sm:$0xff] %vm22_vm3, %v1014_v55  ;;  %v762_v6 = vpop.f32.mrb[23].mxu0  ;;  %v890_v7 = vpop.f32.mrb[23].mxu1  ;;  %v983_v10 = vadd.f32 %v760_v0, %v98_v58 }
 0x128   :  { %v1349_v53 = vmax.f32 %v1285_v47, 0.0  ;;  %v1909_v61 = vpack.c.bf16 %v1348_v49, %v1348_v49  ;;  %v1215_v5 = vmul.f32 %v2487_v34, %v1144_v63  ;;  %v1015_v11 = vadd.f32 %v888_v1, %v130_v59  ;;  %v101_v54 = vld [vmem:[#allocation2 + $0x70] sm:$0xff]  ;;  %v102_v62 = vld [vmem:[#allocation2 + $0x78] sm:$0xff] }
 0x129   :  { %v1878_v2 = vpack.c.bf16 %v1317_v52, %v1317_v52  ;;  %1637 = vst.msk [vmem:[%s2952_s4 + $0x18] sm:$0xf] %vm1630_vm4, %v1877_v60  ;;  %v1254_v12 = vadd.f32 %v2492_v44, %v1183_v4  ;;  %v133_v55 = vld [vmem:[#allocation2 + $0x170] sm:$0xff]  ;;  %v134_v63 = vld [vmem:[#allocation2 + $0x178] sm:$0xff] }
 0x12a   :  { %v1910_v3 = vpack.c.bf16 %v1349_v53, %v1349_v53  ;;  %1669 = vst.msk [vmem:[%s2952_s4 + $0x98] sm:$0xf] %vm1630_vm4, %v1909_v61  ;;  %v1113_v8 = vld [vmem:[#allocation2 + $0x48] sm:$0xff]  ;;  %v1286_v13 = vadd.f32 %v2492_v44, %v1215_v5 }
 0x12b   :  { %v1145_v9 = vld [vmem:[#allocation2 + $0x148] sm:$0xff]  ;;  %1638 = vst.msk [vmem:[%s2952_s4 + $0x1c] sm:$0xf] %vm1630_vm4, %v1878_v2  ;;  %v1184_v14 = vmul.f32 %v2487_v34, %v1113_v8  ;;  %v1318_v16 = vmax.f32 %v1254_v12, 0.0 }
 0x12c   :  { %1670 = vst.msk [vmem:[%s2952_s4 + $0x9c] sm:$0xf] %vm1630_vm4, %v1910_v3  ;;  %v1216_v15 = vmul.f32 %v2487_v34, %v1145_v9  ;;  %v1350_v17 = vmax.f32 %v1286_v13, 0.0  ;;  %v765_v22 = vpop.f32.mrb[24].mxu0  ;;  %v893_v23 = vpop.f32.mrb[24].mxu1 }
 0x12d   :  { %1048 = vst.msk [vmem:[#allocation2 + $0x58] sm:$0xff] %vm22_vm3, %v983_v10  ;;  %1080 = vst.msk [vmem:[#allocation2 + $0x158] sm:$0xff] %vm22_vm3, %v1015_v11  ;;  %v1255_v18 = vadd.f32 %v2492_v44, %v1184_v14  ;;  %v1879_v24 = vpack.c.bf16 %v1318_v16, %v1318_v16  ;;  %v767_v28 = vpop.f32.mrb[25].mxu0  ;;  %v895_v29 = vpop.f32.mrb[25].mxu1  ;;  %v984_v35 = vadd.f32 %v765_v22, %v99_v20 }
 0x12e   :  { %v1287_v19 = vadd.f32 %v2492_v44, %v1216_v15  ;;  %v1911_v25 = vpack.c.bf16 %v1350_v17, %v1350_v17  ;;  %v1114_v32 = vld [vmem:[#allocation2 + $0x50] sm:$0xff]  ;;  %v1016_v36 = vadd.f32 %v893_v23, %v131_v21  ;;  %v768_v37 = vpop.f32.mrb[26].mxu0  ;;  %v896_v38 = vpop.f32.mrb[26].mxu1 }
 0x12f   :  { %v1319_v26 = vmax.f32 %v1255_v18, 0.0  ;;  %v1146_v33 = vld [vmem:[#allocation2 + $0x150] sm:$0xff]  ;;  %1639 = vst.msk [vmem:[%s2952_s4 + $0x20] sm:$0xf] %vm1630_vm4, %v1879_v24  ;;  %v1185_v41 = vmul.f32 %v2487_v34, %v1114_v32  ;;  %v770_v43 = vpop.f32.mrb[27].mxu0  ;;  %v898_v45 = vpop.f32.mrb[27].mxu1  ;;  %v985_v46 = vadd.f32 %v768_v37, %v100_v30  ;;  %v1017_v47 = vadd.f32 %v896_v38, %v132_v31 }
 0x130   :  { %v1351_v27 = vmax.f32 %v1287_v19, 0.0  ;;  %1671 = vst.msk [vmem:[%s2952_s4 + $0xa0] sm:$0xf] %vm1630_vm4, %v1911_v25  ;;  %v1217_v42 = vmul.f32 %v2487_v34, %v1146_v33 }
 0x131   :  { %v1880_v39 = vpack.c.bf16 %v1319_v26, %v1319_v26  ;;  %1049 = vst.msk [vmem:[#allocation2 + $0x60] sm:$0xff] %vm22_vm3, %v984_v35  ;;  %1081 = vst.msk [vmem:[#allocation2 + $0x160] sm:$0xff] %vm22_vm3, %v1016_v36  ;;  %v1256_v48 = vadd.f32 %v2492_v44, %v1185_v41  ;;  %v103_v26 = vld [vmem:[#allocation2 + $0x80] sm:$0xff]  ;;  %v104_v35 = vld [vmem:[#allocation2 + $0x88] sm:$0xff] }
 0x132   :  { %v1912_v40 = vpack.c.bf16 %v1351_v27, %v1351_v27  ;;  %v1288_v49 = vadd.f32 %v2492_v44, %v1217_v42  ;;  %1050 = vst.msk [vmem:[#allocation2 + $0x68] sm:$0xff] %vm22_vm3, %v985_v46  ;;  %1082 = vst.msk [vmem:[#allocation2 + $0x168] sm:$0xff] %vm22_vm3, %v1017_v47  ;;  %v135_v27 = vld [vmem:[#allocation2 + $0x180] sm:$0xff]  ;;  %v136_v36 = vld [vmem:[#allocation2 + $0x188] sm:$0xff] }
 0x133   :  { %1640 = vst.msk [vmem:[%s2952_s4 + $0x24] sm:$0xf] %vm1630_vm4, %v1880_v39  ;;  %v1320_v56 = vmax.f32 %v1256_v48, 0.0 }
 0x134   :  { %1672 = vst.msk [vmem:[%s2952_s4 + $0xa4] sm:$0xf] %vm1630_vm4, %v1912_v40  ;;  %v1115_v50 = vld [vmem:[#allocation2 + $0x58] sm:$0xff]  ;;  %v1352_v57 = vmax.f32 %v1288_v49, 0.0  ;;  %v773_v60 = vpop.f32.mrb[28].mxu0  ;;  %v901_v61 = vpop.f32.mrb[28].mxu1 }
 0x135   :  { %v1147_v51 = vld [vmem:[#allocation2 + $0x158] sm:$0xff]  ;;  %v1186_v52 = vmul.f32 %v2487_v34, %v1115_v50  ;;  %v1881_v0 = vpack.c.bf16 %v1320_v56, %v1320_v56  ;;  %v986_v2 = vadd.f32 %v773_v60, %v101_v54  ;;  %v1018_v3 = vadd.f32 %v901_v61, %v133_v55  ;;  %v775_v4 = vpop.f32.mrb[29].mxu0  ;;  %v903_v5 = vpop.f32.mrb[29].mxu1 }
 0x136   :  { %v1218_v53 = vmul.f32 %v2487_v34, %v1147_v51  ;;  %v1913_v1 = vpack.c.bf16 %v1352_v57, %v1352_v57  ;;  %v776_v8 = vpop.f32.mrb[30].mxu0  ;;  %v904_v9 = vpop.f32.mrb[30].mxu1  ;;  %v105_v4 = vld [vmem:[#allocation2 + $0x90] sm:$0xff] }
 0x137   :  { %v1257_v58 = vadd.f32 %v2492_v44, %v1186_v52  ;;  %1641 = vst.msk [vmem:[%s2952_s4 + $0x28] sm:$0xf] %vm1630_vm4, %v1881_v0  ;;  %v987_v12 = vadd.f32 %v776_v8, %v102_v62  ;;  %v1019_v13 = vadd.f32 %v904_v9, %v134_v63  ;;  %v778_v14 = vpop.f32.mrb[31].mxu0  ;;  %v906_v15 = vpop.f32.mrb[31].mxu1  ;;  %v137_v5 = vld [vmem:[#allocation2 + $0x190] sm:$0xff] }
 0x138   :  { %v1289_v59 = vadd.f32 %v2492_v44, %v1218_v53  ;;  %1673 = vst.msk [vmem:[%s2952_s4 + $0xa8] sm:$0xf] %vm1630_vm4, %v1913_v1  ;;  %v1116_v10 = vld [vmem:[#allocation2 + $0x60] sm:$0xff]  ;;  %v106_v14 = vld [vmem:[#allocation2 + $0x98] sm:$0xff] }
 0x139   :  { %v1321_v6 = vmax.f32 %v1257_v58, 0.0  ;;  %v1148_v11 = vld [vmem:[#allocation2 + $0x160] sm:$0xff]  ;;  %1051 = vst.msk [vmem:[#allocation2 + $0x70] sm:$0xff] %vm22_vm3, %v986_v2  ;;  %1083 = vst.msk [vmem:[#allocation2 + $0x170] sm:$0xff] %vm22_vm3, %v1018_v3  ;;  %v1187_v18 = vmul.f32 %v2487_v34, %v1116_v10  ;;  %v1117_v20 = vld [vmem:[#allocation2 + $0x68] sm:$0xff] }
 0x13a   :  { %v1353_v7 = vmax.f32 %v1289_v59, 0.0  ;;  %v1219_v19 = vmul.f32 %v2487_v34, %v1148_v11  ;;  %v1149_v21 = vld [vmem:[#allocation2 + $0x168] sm:$0xff]  ;;  %1052 = vst.msk [vmem:[#allocation2 + $0x78] sm:$0xff] %vm22_vm3, %v987_v12  ;;  %1084 = vst.msk [vmem:[#allocation2 + $0x178] sm:$0xff] %vm22_vm3, %v1019_v13  ;;  %v1188_v24 = vmul.f32 %v2487_v34, %v1117_v20  ;;  %v138_v15 = vld [vmem:[#allocation2 + $0x198] sm:$0xff] }
 0x13b   :  { %v1882_v16 = vpack.c.bf16 %v1321_v6, %v1321_v6  ;;  %v1258_v22 = vadd.f32 %v2492_v44, %v1187_v18  ;;  %v1220_v25 = vmul.f32 %v2487_v34, %v1149_v21 }
 0x13c   :  { %v1914_v17 = vpack.c.bf16 %v1353_v7, %v1353_v7  ;;  %v1290_v23 = vadd.f32 %v2492_v44, %v1219_v19  ;;  %v1259_v30 = vadd.f32 %v2492_v44, %v1188_v24  ;;  %v781_v32 = vpop.f32.mrb[32].mxu0  ;;  %v909_v33 = vpop.f32.mrb[32].mxu1 }
 0x13d   :  { %1642 = vst.msk [vmem:[%s2952_s4 + $0x2c] sm:$0xf] %vm1630_vm4, %v1882_v16  ;;  %v1322_v28 = vmax.f32 %v1258_v22, 0.0  ;;  %v1291_v31 = vadd.f32 %v2492_v44, %v1220_v25  ;;  %v988_v37 = vadd.f32 %v781_v32, %v103_v26  ;;  %v1020_v38 = vadd.f32 %v909_v33, %v135_v27  ;;  %v783_v39 = vpop.f32.mrb[33].mxu0  ;;  %v911_v40 = vpop.f32.mrb[33].mxu1 }
 0x13e   :  { %1674 = vst.msk [vmem:[%s2952_s4 + $0xac] sm:$0xf] %vm1630_vm4, %v1914_v17  ;;  %v1354_v29 = vmax.f32 %v1290_v23, 0.0  ;;  %v1323_v43 = vmax.f32 %v1259_v30, 0.0  ;;  %v784_v48 = vpop.f32.mrb[34].mxu0  ;;  %v912_v49 = vpop.f32.mrb[34].mxu1 }
 0x13f   :  { %v1883_v41 = vpack.c.bf16 %v1322_v28, %v1322_v28  ;;  %v1355_v45 = vmax.f32 %v1291_v31, 0.0  ;;  %1053 = vst.msk [vmem:[#allocation2 + $0x80] sm:$0xff] %vm22_vm3, %v988_v37  ;;  %1085 = vst.msk [vmem:[#allocation2 + $0x180] sm:$0xff] %vm22_vm3, %v1020_v38  ;;  %v989_v52 = vadd.f32 %v784_v48, %v104_v35  ;;  %v1021_v53 = vadd.f32 %v912_v49, %v136_v36  ;;  %v786_v54 = vpop.f32.mrb[35].mxu0  ;;  %v914_v55 = vpop.f32.mrb[35].mxu1 }
 0x140   :  { %v1915_v42 = vpack.c.bf16 %v1354_v29, %v1354_v29  ;;  %v1118_v46 = vld [vmem:[#allocation2 + $0x70] sm:$0xff]  ;;  %v1884_v56 = vpack.c.bf16 %v1323_v43, %v1323_v43 }
 0x141   :  { %v1150_v47 = vld [vmem:[#allocation2 + $0x170] sm:$0xff]  ;;  %v1189_v50 = vmul.f32 %v2487_v34, %v1118_v46  ;;  %1643 = vst.msk [vmem:[%s2952_s4 + $0x30] sm:$0xf] %vm1630_vm4, %v1883_v41  ;;  %v1916_v57 = vpack.c.bf16 %v1355_v45, %v1355_v45  ;;  %v1119_v58 = vld [vmem:[#allocation2 + $0x78] sm:$0xff]  ;;  %v107_v41 = vld [vmem:[#allocation2 + $0xa0] sm:$0xff] }
 0x142   :  { %v1221_v51 = vmul.f32 %v2487_v34, %v1150_v47  ;;  %1675 = vst.msk [vmem:[%s2952_s4 + $0xb0] sm:$0xf] %vm1630_vm4, %v1915_v42  ;;  %v1151_v59 = vld [vmem:[#allocation2 + $0x178] sm:$0xff]  ;;  %v1190_v62 = vmul.f32 %v2487_v34, %v1119_v58  ;;  %1644 = vst.msk [vmem:[%s2952_s4 + $0x34] sm:$0xf] %vm1630_vm4, %v1884_v56  ;;  %v139_v42 = vld [vmem:[#allocation2 + $0x1a0] sm:$0xff] }
 0x143   :  { %v1260_v60 = vadd.f32 %v2492_v44, %v1189_v50  ;;  %v1222_v63 = vmul.f32 %v2487_v34, %v1151_v59  ;;  %1054 = vst.msk [vmem:[#allocation2 + $0x88] sm:$0xff] %vm22_vm3, %v989_v52  ;;  %1086 = vst.msk [vmem:[#allocation2 + $0x188] sm:$0xff] %vm22_vm3, %v1021_v53  ;;  %v108_v46 = vld [vmem:[#allocation2 + $0xa8] sm:$0xff] }
 0x144   :  { %v1292_v61 = vadd.f32 %v2492_v44, %v1221_v51  ;;  %1676 = vst.msk [vmem:[%s2952_s4 + $0xb4] sm:$0xf] %vm1630_vm4, %v1916_v57  ;;  %v1261_v2 = vadd.f32 %v2492_v44, %v1190_v62  ;;  %v789_v6 = vpop.f32.mrb[36].mxu0  ;;  %v917_v7 = vpop.f32.mrb[36].mxu1  ;;  %v140_v47 = vld [vmem:[#allocation2 + $0x1a8] sm:$0xff] }
 0x145   :  { %v1324_v0 = vmax.f32 %v1260_v60, 0.0  ;;  %v1293_v3 = vadd.f32 %v2492_v44, %v1222_v63  ;;  %v791_v12 = vpop.f32.mrb[37].mxu0  ;;  %v919_v13 = vpop.f32.mrb[37].mxu1  ;;  %v990_v18 = vadd.f32 %v789_v6, %v105_v4  ;;  %v1022_v19 = vadd.f32 %v917_v7, %v137_v5 }
 0x146   :  { %v1356_v1 = vmax.f32 %v1292_v61, 0.0  ;;  %v1325_v10 = vmax.f32 %v1261_v2, 0.0  ;;  %v1120_v16 = vld [vmem:[#allocation2 + $0x80] sm:$0xff]  ;;  %v792_v20 = vpop.f32.mrb[38].mxu0  ;;  %v920_v21 = vpop.f32.mrb[38].mxu1 }
 0x147   :  { %v1885_v8 = vpack.c.bf16 %v1324_v0, %v1324_v0  ;;  %v1357_v11 = vmax.f32 %v1293_v3, 0.0  ;;  %v1152_v17 = vld [vmem:[#allocation2 + $0x180] sm:$0xff]  ;;  %v1191_v24 = vmul.f32 %v2487_v34, %v1120_v16  ;;  %v794_v26 = vpop.f32.mrb[39].mxu0  ;;  %v922_v27 = vpop.f32.mrb[39].mxu1  ;;  %1055 = vst.msk [vmem:[#allocation2 + $0x90] sm:$0xff] %vm22_vm3, %v990_v18  ;;  %1087 = vst.msk [vmem:[#allocation2 + $0x190] sm:$0xff] %vm22_vm3, %v1022_v19  ;;  %v991_v30 = vadd.f32 %v792_v20, %v106_v14 }
 0x148   :  { %v1917_v9 = vpack.c.bf16 %v1356_v1, %v1356_v1  ;;  %v1886_v22 = vpack.c.bf16 %v1325_v10, %v1325_v10  ;;  %v1223_v25 = vmul.f32 %v2487_v34, %v1152_v17  ;;  %v1023_v31 = vadd.f32 %v920_v21, %v138_v15  ;;  %v109_v10 = vld [vmem:[#allocation2 + $0xb0] sm:$0xff]  ;;  %v110_v18 = vld [vmem:[#allocation2 + $0xb8] sm:$0xff] }
 0x149   :  { %1645 = vst.msk [vmem:[%s2952_s4 + $0x38] sm:$0xf] %vm1630_vm4, %v1885_v8  ;;  %v1918_v23 = vpack.c.bf16 %v1357_v11, %v1357_v11  ;;  %v1262_v32 = vadd.f32 %v2492_v44, %v1191_v24  ;;  %v141_v11 = vld [vmem:[#allocation2 + $0x1b0] sm:$0xff]  ;;  %v142_v19 = vld [vmem:[#allocation2 + $0x1b8] sm:$0xff] }
 0x14a   :  { %1677 = vst.msk [vmem:[%s2952_s4 + $0xb8] sm:$0xf] %vm1630_vm4, %v1917_v9  ;;  %v1121_v28 = vld [vmem:[#allocation2 + $0x88] sm:$0xff]  ;;  %1646 = vst.msk [vmem:[%s2952_s4 + $0x3c] sm:$0xf] %vm1630_vm4, %v1886_v22  ;;  %v1294_v33 = vadd.f32 %v2492_v44, %v1223_v25 }
 0x14b   :  { %v1153_v29 = vld [vmem:[#allocation2 + $0x188] sm:$0xff]  ;;  %1678 = vst.msk [vmem:[%s2952_s4 + $0xbc] sm:$0xf] %vm1630_vm4, %v1918_v23  ;;  %v1192_v35 = vmul.f32 %v2487_v34, %v1121_v28  ;;  %v1326_v37 = vmax.f32 %v1262_v32, 0.0 }
 0x14c   :  { %v1224_v36 = vmul.f32 %v2487_v34, %v1153_v29  ;;  %1056 = vst.msk [vmem:[#allocation2 + $0x98] sm:$0xff] %vm22_vm3, %v991_v30  ;;  %1088 = vst.msk [vmem:[#allocation2 + $0x198] sm:$0xff] %vm22_vm3, %v1023_v31  ;;  %v1358_v38 = vmax.f32 %v1294_v33, 0.0  ;;  %v797_v43 = vpop.f32.mrb[40].mxu0  ;;  %v925_v45 = vpop.f32.mrb[40].mxu1 }
 0x14d   :  { %v1263_v39 = vadd.f32 %v2492_v44, %v1192_v35  ;;  %v1887_v48 = vpack.c.bf16 %v1326_v37, %v1326_v37  ;;  %v799_v52 = vpop.f32.mrb[41].mxu0  ;;  %v927_v53 = vpop.f32.mrb[41].mxu1  ;;  %v992_v54 = vadd.f32 %v797_v43, %v107_v41  ;;  %v1024_v55 = vadd.f32 %v925_v45, %v139_v42 }
 0x14e   :  { %v1295_v40 = vadd.f32 %v2492_v44, %v1224_v36  ;;  %v1919_v49 = vpack.c.bf16 %v1358_v38, %v1358_v38  ;;  %v800_v56 = vpop.f32.mrb[42].mxu0  ;;  %v928_v57 = vpop.f32.mrb[42].mxu1  ;;  %v1122_v60 = vld [vmem:[#allocation2 + $0x90] sm:$0xff] }
 0x14f   :  { %v1327_v50 = vmax.f32 %v1263_v39, 0.0  ;;  %1647 = vst.msk [vmem:[%s2952_s4 + $0x40] sm:$0xf] %vm1630_vm4, %v1887_v48  ;;  %v1154_v61 = vld [vmem:[#allocation2 + $0x190] sm:$0xff]  ;;  %v993_v62 = vadd.f32 %v800_v56, %v108_v46  ;;  %v1025_v63 = vadd.f32 %v928_v57, %v140_v47  ;;  %v802_v0 = vpop.f32.mrb[43].mxu0  ;;  %v930_v1 = vpop.f32.mrb[43].mxu1  ;;  %v1193_v2 = vmul.f32 %v2487_v34, %v1122_v60 }
 0x150   :  { %v1359_v51 = vmax.f32 %v1295_v40, 0.0  ;;  %1679 = vst.msk [vmem:[%s2952_s4 + $0xc0] sm:$0xf] %vm1630_vm4, %v1919_v49  ;;  %v1225_v3 = vmul.f32 %v2487_v34, %v1154_v61  ;;  %v111_v48 = vld [vmem:[#allocation2 + $0xc0] sm:$0xff] }
 0x151   :  { %v1888_v58 = vpack.c.bf16 %v1327_v50, %v1327_v50  ;;  %1057 = vst.msk [vmem:[#allocation2 + $0xa0] sm:$0xff] %vm22_vm3, %v992_v54  ;;  %1089 = vst.msk [vmem:[#allocation2 + $0x1a0] sm:$0xff] %vm22_vm3, %v1024_v55  ;;  %v1264_v6 = vadd.f32 %v2492_v44, %v1193_v2  ;;  %v143_v49 = vld [vmem:[#allocation2 + $0x1c0] sm:$0xff] }
 0x152   :  { %v1920_v59 = vpack.c.bf16 %v1359_v51, %v1359_v51  ;;  %1058 = vst.msk [vmem:[#allocation2 + $0xa8] sm:$0xff] %vm22_vm3, %v993_v62  ;;  %1090 = vst.msk [vmem:[#allocation2 + $0x1a8] sm:$0xff] %vm22_vm3, %v1025_v63  ;;  %v1296_v7 = vadd.f32 %v2492_v44, %v1225_v3  ;;  %v112_v62 = vld [vmem:[#allocation2 + $0xc8] sm:$0xff] }
 0x153   :  { %1648 = vst.msk [vmem:[%s2952_s4 + $0x44] sm:$0xf] %vm1630_vm4, %v1888_v58  ;;  %v1123_v4 = vld [vmem:[#allocation2 + $0x98] sm:$0xff]  ;;  %v1328_v12 = vmax.f32 %v1264_v6, 0.0  ;;  %v144_v63 = vld [vmem:[#allocation2 + $0x1c8] sm:$0xff] }
 0x154   :  { %1680 = vst.msk [vmem:[%s2952_s4 + $0xc4] sm:$0xf] %vm1630_vm4, %v1920_v59  ;;  %v1155_v5 = vld [vmem:[#allocation2 + $0x198] sm:$0xff]  ;;  %v1194_v8 = vmul.f32 %v2487_v34, %v1123_v4  ;;  %v1360_v13 = vmax.f32 %v1296_v7, 0.0  ;;  %v805_v16 = vpop.f32.mrb[44].mxu0  ;;  %v933_v17 = vpop.f32.mrb[44].mxu1 }
 0x155   :  { %v1226_v9 = vmul.f32 %v2487_v34, %v1155_v5  ;;  %v994_v20 = vadd.f32 %v805_v16, %v109_v10  ;;  %v1026_v21 = vadd.f32 %v933_v17, %v141_v11  ;;  %v807_v22 = vpop.f32.mrb[45].mxu0  ;;  %v935_v23 = vpop.f32.mrb[45].mxu1  ;;  %v1889_v24 = vpack.c.bf16 %v1328_v12, %v1328_v12  ;;  %v2811_v17 = vld [vmem:[%s2950_s2] ss:$0 sm:$0xff] }
 0x156   :  { %v1265_v14 = vadd.f32 %v2492_v44, %v1194_v8  ;;  %v1921_v25 = vpack.c.bf16 %v1360_v13, %v1360_v13  ;;  %v808_v28 = vpop.f32.mrb[46].mxu0  ;;  %v936_v29 = vpop.f32.mrb[46].mxu1 }
 0x157   :  { %v1297_v15 = vadd.f32 %v2492_v44, %v1226_v9  ;;  %1059 = vst.msk [vmem:[#allocation2 + $0xb0] sm:$0xff] %vm22_vm3, %v994_v20  ;;  %1091 = vst.msk [vmem:[#allocation2 + $0x1b0] sm:$0xff] %vm22_vm3, %v1026_v21  ;;  %v995_v32 = vadd.f32 %v808_v28, %v110_v18  ;;  %v1027_v33 = vadd.f32 %v936_v29, %v142_v19  ;;  %v810_v35 = vpop.f32.mrb[47].mxu0  ;;  %v938_v36 = vpop.f32.mrb[47].mxu1 }
 0x158   :  { %v1329_v26 = vmax.f32 %v1265_v14, 0.0  ;;  %v1124_v30 = vld [vmem:[#allocation2 + $0xa0] sm:$0xff]  ;;  %1649 = vst.msk [vmem:[%s2952_s4 + $0x48] sm:$0xf] %vm1630_vm4, %v1889_v24  ;;  %1681 = vst.msk [vmem:[%s2952_s4 + $0xc8] sm:$0xf] %vm1630_vm4, %v1921_v25 }
 0x159   :  { %v1361_v27 = vmax.f32 %v1297_v15, 0.0  ;;  %v1156_v31 = vld [vmem:[#allocation2 + $0x1a0] sm:$0xff]  ;;  %v1195_v39 = vmul.f32 %v2487_v34, %v1124_v30  ;;  %v1125_v41 = vld [vmem:[#allocation2 + $0xa8] sm:$0xff]  ;;  %1060 = vst.msk [vmem:[#allocation2 + $0xb8] sm:$0xff] %vm22_vm3, %v995_v32  ;;  %1092 = vst.msk [vmem:[#allocation2 + $0x1b8] sm:$0xff] %vm22_vm3, %v1027_v33 }
 0x15a   :  { %v1890_v37 = vpack.c.bf16 %v1329_v26, %v1329_v26  ;;  %v1227_v40 = vmul.f32 %v2487_v34, %v1156_v31  ;;  %v1157_v42 = vld [vmem:[#allocation2 + $0x1a8] sm:$0xff]  ;;  %v1196_v43 = vmul.f32 %v2487_v34, %v1125_v41  ;;  %v113_v24 = vld [vmem:[#allocation2 + $0xd0] sm:$0xff]  ;;  %v114_v35 = vld [vmem:[#allocation2 + $0xd8] sm:$0xff] }
 0x15b   :  { %v1922_v38 = vpack.c.bf16 %v1361_v27, %v1361_v27  ;;  %v1228_v45 = vmul.f32 %v2487_v34, %v1157_v42  ;;  %v1266_v46 = vadd.f32 %v2492_v44, %v1195_v39  ;;  %v145_v25 = vld [vmem:[#allocation2 + $0x1d0] sm:$0xff]  ;;  %v146_v36 = vld [vmem:[#allocation2 + $0x1d8] sm:$0xff] }
 0x15c   :  { %1650 = vst.msk [vmem:[%s2952_s4 + $0x4c] sm:$0xf] %vm1630_vm4, %v1890_v37  ;;  %v1298_v47 = vadd.f32 %v2492_v44, %v1227_v40  ;;  %v1267_v50 = vadd.f32 %v2492_v44, %v1196_v43  ;;  %v813_v54 = vpop.f32.mrb[48].mxu0  ;;  %v941_v55 = vpop.f32.mrb[48].mxu1 }
 0x15d   :  { %1682 = vst.msk [vmem:[%s2952_s4 + $0xcc] sm:$0xf] %vm1630_vm4, %v1922_v38  ;;  %v1299_v51 = vadd.f32 %v2492_v44, %v1228_v45  ;;  %v1330_v52 = vmax.f32 %v1266_v46, 0.0  ;;  %v996_v58 = vadd.f32 %v813_v54, %v111_v48  ;;  %v1028_v59 = vadd.f32 %v941_v55, %v143_v49  ;;  %v815_v60 = vpop.f32.mrb[49].mxu0  ;;  %v943_v61 = vpop.f32.mrb[49].mxu1 }
 0x15e   :  { %v1362_v53 = vmax.f32 %v1298_v47, 0.0  ;;  %v1331_v56 = vmax.f32 %v1267_v50, 0.0  ;;  %v1126_v2 = vld [vmem:[#allocation2 + $0xb0] sm:$0xff]  ;;  %v816_v4 = vpop.f32.mrb[50].mxu0  ;;  %v944_v5 = vpop.f32.mrb[50].mxu1 }
 0x15f   :  { %v1363_v57 = vmax.f32 %v1299_v51, 0.0  ;;  %v1891_v0 = vpack.c.bf16 %v1330_v52, %v1330_v52  ;;  %v1158_v3 = vld [vmem:[#allocation2 + $0x1b0] sm:$0xff]  ;;  %v1197_v8 = vmul.f32 %v2487_v34, %v1126_v2  ;;  %1061 = vst.msk [vmem:[#allocation2 + $0xc0] sm:$0xff] %vm22_vm3, %v996_v58  ;;  %1093 = vst.msk [vmem:[#allocation2 + $0x1c0] sm:$0xff] %vm22_vm3, %v1028_v59  ;;  %v818_v10 = vpop.f32.mrb[51].mxu0  ;;  %v946_v11 = vpop.f32.mrb[51].mxu1  ;;  %v997_v14 = vadd.f32 %v816_v4, %v112_v62 }
 0x160   :  { %v1923_v1 = vpack.c.bf16 %v1362_v53, %v1362_v53  ;;  %v1892_v6 = vpack.c.bf16 %v1331_v56, %v1331_v56  ;;  %v1229_v9 = vmul.f32 %v2487_v34, %v1158_v3  ;;  %v1127_v12 = vld [vmem:[#allocation2 + $0xb8] sm:$0xff]  ;;  %v1029_v34 = vadd.f32 %v944_v5, %v144_v63  ;;  %v2842_v51 = vld [vmem:[%s2951_s3] ss:$0 sm:$0xff]  ;;  %v116_v2 = vld [vmem:[#allocation2 + $0xe8] sm:$0xff] }
 0x161   :  { %v1924_v7 = vpack.c.bf16 %v1363_v57, %v1363_v57  ;;  %1651 = vst.msk [vmem:[%s2952_s4 + $0x50] sm:$0xf] %vm1630_vm4, %v1891_v0  ;;  %v1159_v13 = vld [vmem:[#allocation2 + $0x1b8] sm:$0xff]  ;;  %v1268_v15 = vadd.f32 %v2492_v44, %v1197_v8  ;;  %v1198_v18 = vmul.f32 %v2811_v17, %v1127_v12  ;;  %v115_v58 = vld [vmem:[#allocation2 + $0xe0] sm:$0xff]  ;;  %v148_v3 = vld [vmem:[#allocation2 + $0x1e8] sm:$0xff] }
 0x162   :  { %1683 = vst.msk [vmem:[%s2952_s4 + $0xd0] sm:$0xf] %vm1630_vm4, %v1923_v1  ;;  %1652 = vst.msk [vmem:[%s2952_s4 + $0x54] sm:$0xf] %vm1630_vm4, %v1892_v6  ;;  %v1300_v16 = vadd.f32 %v2492_v44, %v1229_v9  ;;  %v1230_v19 = vmul.f32 %v2811_v17, %v1159_v13  ;;  %v147_v59 = vld [vmem:[#allocation2 + $0x1e0] sm:$0xff] }
 0x163   :  { %1684 = vst.msk [vmem:[%s2952_s4 + $0xd4] sm:$0xf] %vm1630_vm4, %v1924_v7  ;;  %v1332_v20 = vmax.f32 %v1268_v15, 0.0  ;;  %v1269_v22 = vadd.f32 %v2492_v44, %v1198_v18 }
 0x164   :  { %1062 = vst.msk [vmem:[#allocation2 + $0xc8] sm:$0xff] %vm22_vm3, %v997_v14  ;;  %1094 = vst.msk [vmem:[#allocation2 + $0x1c8] sm:$0xff] %vm22_vm3, %v1029_v34  ;;  %v1364_v21 = vmax.f32 %v1300_v16, 0.0  ;;  %v1301_v23 = vadd.f32 %v2492_v44, %v1230_v19  ;;  %v821_v26 = vpop.f32.mrb[52].mxu0  ;;  %v949_v27 = vpop.f32.mrb[52].mxu1 }
 0x165   :  { %v1893_v28 = vpack.c.bf16 %v1332_v20, %v1332_v20  ;;  %v1333_v30 = vmax.f32 %v1269_v22, 0.0  ;;  %v823_v32 = vpop.f32.mrb[53].mxu0  ;;  %v951_v33 = vpop.f32.mrb[53].mxu1  ;;  %v998_v39 = vadd.f32 %v821_v26, %v113_v24  ;;  %v1030_v40 = vadd.f32 %v949_v27, %v145_v25 }
 0x166   :  { %v1925_v29 = vpack.c.bf16 %v1364_v21, %v1364_v21  ;;  %v1365_v31 = vmax.f32 %v1301_v23, 0.0  ;;  %v1128_v37 = vld [vmem:[#allocation2 + $0xc0] sm:$0xff]  ;;  %v824_v41 = vpop.f32.mrb[54].mxu0  ;;  %v952_v42 = vpop.f32.mrb[54].mxu1 }
 0x167   :  { %v1160_v38 = vld [vmem:[#allocation2 + $0x1c0] sm:$0xff]  ;;  %1653 = vst.msk [vmem:[%s2952_s4 + $0x58] sm:$0xf] %vm1630_vm4, %v1893_v28  ;;  %v1894_v44 = vpack.c.bf16 %v1333_v30, %v1333_v30  ;;  %v1199_v45 = vmul.f32 %v2811_v17, %v1128_v37  ;;  %v826_v47 = vpop.f32.mrb[55].mxu0  ;;  %v954_v48 = vpop.f32.mrb[55].mxu1  ;;  %v999_v49 = vadd.f32 %v824_v41, %v114_v35  ;;  %v1031_v50 = vadd.f32 %v952_v42, %v146_v36  ;;  %v117_v30 = vld [vmem:[#allocation2 + $0xf0] sm:$0xff] }
 0x168   :  { %1685 = vst.msk [vmem:[%s2952_s4 + $0xd8] sm:$0xf] %vm1630_vm4, %v1925_v29  ;;  %v1926_v43 = vpack.c.bf16 %v1365_v31, %v1365_v31  ;;  %v1231_v46 = vmul.f32 %v2811_v17, %v1160_v38  ;;  %v149_v31 = vld [vmem:[#allocation2 + $0x1f0] sm:$0xff] }
 0x169   :  { %1063 = vst.msk [vmem:[#allocation2 + $0xd0] sm:$0xff] %vm22_vm3, %v998_v39  ;;  %1095 = vst.msk [vmem:[#allocation2 + $0x1d0] sm:$0xff] %vm22_vm3, %v1030_v40  ;;  %v1270_v52 = vadd.f32 %v2842_v51, %v1199_v45  ;;  %v118_v39 = vld [vmem:[#allocation2 + $0xf8] sm:$0xff] }
 0x16a   :  { %1654 = vst.msk [vmem:[%s2952_s4 + $0x5c] sm:$0xf] %vm1630_vm4, %v1894_v44  ;;  %1686 = vst.msk [vmem:[%s2952_s4 + $0xdc] sm:$0xf] %vm1630_vm4, %v1926_v43  ;;  %v1302_v53 = vadd.f32 %v2842_v51, %v1231_v46  ;;  %v150_v40 = vld [vmem:[#allocation2 + $0x1f8] sm:$0xff] }
 0x16b   :  { %v1129_v54 = vld [vmem:[#allocation2 + $0xc8] sm:$0xff]  ;;  %1064 = vst.msk [vmem:[#allocation2 + $0xd8] sm:$0xff] %vm22_vm3, %v999_v49  ;;  %1096 = vst.msk [vmem:[#allocation2 + $0x1d8] sm:$0xff] %vm22_vm3, %v1031_v50  ;;  %v1334_v60 = vmax.f32 %v1270_v52, 0.0 }
 0x16c   :  { %v1161_v55 = vld [vmem:[#allocation2 + $0x1c8] sm:$0xff]  ;;  %v1200_v56 = vmul.f32 %v2811_v17, %v1129_v54  ;;  %v1366_v61 = vmax.f32 %v1302_v53, 0.0  ;;  %v829_v0 = vpop.f32.mrb[56].mxu0  ;;  %v957_v1 = vpop.f32.mrb[56].mxu1 }
 0x16d   :  { %v1232_v57 = vmul.f32 %v2811_v17, %v1161_v55  ;;  %v1895_v4 = vpack.c.bf16 %v1334_v60, %v1334_v60  ;;  %v1000_v6 = vadd.f32 %v829_v0, %v115_v58  ;;  %v1032_v7 = vadd.f32 %v957_v1, %v147_v59  ;;  %v831_v8 = vpop.f32.mrb[57].mxu0  ;;  %v959_v9 = vpop.f32.mrb[57].mxu1 }
 0x16e   :  { %v1271_v62 = vadd.f32 %v2842_v51, %v1200_v56  ;;  %v1927_v5 = vpack.c.bf16 %v1366_v61, %v1366_v61  ;;  %v832_v12 = vpop.f32.mrb[58].mxu0  ;;  %v960_v13 = vpop.f32.mrb[58].mxu1 }
 0x16f   :  { %v1303_v63 = vadd.f32 %v2842_v51, %v1232_v57  ;;  %1655 = vst.msk [vmem:[%s2952_s4 + $0x60] sm:$0xf] %vm1630_vm4, %v1895_v4  ;;  %v1001_v15 = vadd.f32 %v832_v12, %v116_v2  ;;  %v1033_v16 = vadd.f32 %v960_v13, %v148_v3  ;;  %v834_v18 = vpop.f32.mrb[59].mxu0  ;;  %v962_v19 = vpop.f32.mrb[59].mxu1 }
 0x170   :  { %v1335_v10 = vmax.f32 %v1271_v62, 0.0  ;;  %1687 = vst.msk [vmem:[%s2952_s4 + $0xe0] sm:$0xf] %vm1630_vm4, %v1927_v5  ;;  %v1130_v14 = vld [vmem:[#allocation2 + $0xd0] sm:$0xff] }
 0x171   :  { %v1367_v11 = vmax.f32 %v1303_v63, 0.0  ;;  %v1162_v34 = vld [vmem:[#allocation2 + $0x1d0] sm:$0xff]  ;;  %1065 = vst.msk [vmem:[#allocation2 + $0xe0] sm:$0xff] %vm22_vm3, %v1000_v6  ;;  %1097 = vst.msk [vmem:[#allocation2 + $0x1e0] sm:$0xff] %vm22_vm3, %v1032_v7  ;;  %v1201_v22 = vmul.f32 %v2811_v17, %v1130_v14 }
 0x172   :  { %v1896_v20 = vpack.c.bf16 %v1335_v10, %v1335_v10  ;;  %v1233_v23 = vmul.f32 %v2811_v17, %v1162_v34  ;;  %v1131_v24 = vld [vmem:[#allocation2 + $0xd8] sm:$0xff]  ;;  %1066 = vst.msk [vmem:[#allocation2 + $0xe8] sm:$0xff] %vm22_vm3, %v1001_v15  ;;  %1098 = vst.msk [vmem:[#allocation2 + $0x1e8] sm:$0xff] %vm22_vm3, %v1033_v16 }
 0x173   :  { %v1928_v21 = vpack.c.bf16 %v1367_v11, %v1367_v11  ;;  %v1163_v25 = vld [vmem:[#allocation2 + $0x1d8] sm:$0xff]  ;;  %v1272_v26 = vadd.f32 %v2842_v51, %v1201_v22  ;;  %v1202_v28 = vmul.f32 %v2811_v17, %v1131_v24 }
 0x174   :  { %1656 = vst.msk [vmem:[%s2952_s4 + $0x64] sm:$0xf] %vm1630_vm4, %v1896_v20  ;;  %v1304_v27 = vadd.f32 %v2842_v51, %v1233_v23  ;;  %v1234_v29 = vmul.f32 %v2811_v17, %v1163_v25  ;;  %v837_v37 = vpop.f32.mrb[60].mxu0  ;;  %v965_v38 = vpop.f32.mrb[60].mxu1 }
 0x175   :  { %1688 = vst.msk [vmem:[%s2952_s4 + $0xe4] sm:$0xf] %vm1630_vm4, %v1928_v21  ;;  %v1336_v32 = vmax.f32 %v1272_v26, 0.0  ;;  %v1273_v35 = vadd.f32 %v2842_v51, %v1202_v28  ;;  %v1002_v41 = vadd.f32 %v837_v37, %v117_v30  ;;  %v1034_v42 = vadd.f32 %v965_v38, %v149_v31  ;;  %v839_v44 = vpop.f32.mrb[61].mxu0  ;;  %v967_v43 = vpop.f32.mrb[61].mxu1 }
 0x176   :  { %v1368_v33 = vmax.f32 %v1304_v27, 0.0  ;;  %v1305_v36 = vadd.f32 %v2842_v51, %v1234_v29  ;;  %v840_v52 = vpop.f32.mrb[62].mxu0  ;;  %v968_v53 = vpop.f32.mrb[62].mxu1 }
 0x177   :  { %v1897_v45 = vpack.c.bf16 %v1336_v32, %v1336_v32  ;;  %v1337_v47 = vmax.f32 %v1273_v35, 0.0  ;;  %1067 = vst.msk [vmem:[#allocation2 + $0xf0] sm:$0xff] %vm22_vm3, %v1002_v41  ;;  %1099 = vst.msk [vmem:[#allocation2 + $0x1f0] sm:$0xff] %vm22_vm3, %v1034_v42  ;;  %v1003_v56 = vadd.f32 %v840_v52, %v118_v39  ;;  %v1035_v57 = vadd.f32 %v968_v53, %v150_v40  ;;  %v842_v58 = vpop.f32.mrb[63].mxu0  ;;  %v970_v59 = vpop.f32.mrb[63].mxu1 }
 0x178   :  { %v1929_v46 = vpack.c.bf16 %v1368_v33, %v1368_v33  ;;  %v1369_v48 = vmax.f32 %v1305_v36, 0.0  ;;  %v1132_v49 = vld [vmem:[#allocation2 + $0xe0] sm:$0xff] }
 0x179   :  { %v1164_v50 = vld [vmem:[#allocation2 + $0x1e0] sm:$0xff]  ;;  %v1203_v54 = vmul.f32 %v2811_v17, %v1132_v49  ;;  %1657 = vst.msk [vmem:[%s2952_s4 + $0x68] sm:$0xf] %vm1630_vm4, %v1897_v45  ;;  %v1898_v60 = vpack.c.bf16 %v1337_v47, %v1337_v47  ;;  %v1133_v62 = vld [vmem:[#allocation2 + $0xe8] sm:$0xff] }
 0x17a   :  { %v1235_v55 = vmul.f32 %v2811_v17, %v1164_v50  ;;  %1689 = vst.msk [vmem:[%s2952_s4 + $0xe8] sm:$0xf] %vm1630_vm4, %v1929_v46  ;;  %v1930_v61 = vpack.c.bf16 %v1369_v48, %v1369_v48  ;;  %v1165_v63 = vld [vmem:[#allocation2 + $0x1e8] sm:$0xff]  ;;  %v1204_v2 = vmul.f32 %v2811_v17, %v1133_v62 }
 0x17b   :  { %v1274_v0 = vadd.f32 %v2842_v51, %v1203_v54  ;;  %v1236_v3 = vmul.f32 %v2811_v17, %v1165_v63  ;;  %1068 = vst.msk [vmem:[#allocation2 + $0xf8] sm:$0xff] %vm22_vm3, %v1003_v56  ;;  %1100 = vst.msk [vmem:[#allocation2 + $0x1f8] sm:$0xff] %vm22_vm3, %v1035_v57 }
 0x17c   :  { %v1306_v1 = vadd.f32 %v2842_v51, %v1235_v55  ;;  %1658 = vst.msk [vmem:[%s2952_s4 + $0x6c] sm:$0xf] %vm1630_vm4, %v1898_v60  ;;  %1690 = vst.msk [vmem:[%s2952_s4 + $0xec] sm:$0xf] %vm1630_vm4, %v1930_v61  ;;  %v1275_v6 = vadd.f32 %v2842_v51, %v1204_v2 }
 0x17d   :  { %v1338_v4 = vmax.f32 %v1274_v0, 0.0  ;;  %v1307_v7 = vadd.f32 %v2842_v51, %v1236_v3 }
 0x17e   :  { %v1370_v5 = vmax.f32 %v1306_v1, 0.0  ;;  %v1339_v10 = vmax.f32 %v1275_v6, 0.0  ;;  %v1134_v12 = vld [vmem:[#allocation2 + $0xf0] sm:$0xff] }
 0x17f   :  { %v1899_v8 = vpack.c.bf16 %v1338_v4, %v1338_v4  ;;  %v1371_v11 = vmax.f32 %v1307_v7, 0.0  ;;  %v1166_v13 = vld [vmem:[#allocation2 + $0x1f0] sm:$0xff]  ;;  %v1205_v15 = vmul.f32 %v2811_v17, %v1134_v12 }
 0x180   :  { %v1931_v9 = vpack.c.bf16 %v1370_v5, %v1370_v5  ;;  %v1900_v14 = vpack.c.bf16 %v1339_v10, %v1339_v10  ;;  %v1237_v16 = vmul.f32 %v2811_v17, %v1166_v13 }
 0x181   :  { %1659 = vst.msk [vmem:[%s2952_s4 + $0x70] sm:$0xf] %vm1630_vm4, %v1899_v8  ;;  %v1932_v34 = vpack.c.bf16 %v1371_v11, %v1371_v11  ;;  %v1276_v20 = vadd.f32 %v2842_v51, %v1205_v15 }
 0x182   :  { %1691 = vst.msk [vmem:[%s2952_s4 + $0xf0] sm:$0xf] %vm1630_vm4, %v1931_v9  ;;  %v1135_v18 = vld [vmem:[#allocation2 + $0xf8] sm:$0xff]  ;;  %1660 = vst.msk [vmem:[%s2952_s4 + $0x74] sm:$0xf] %vm1630_vm4, %v1900_v14  ;;  %v1308_v21 = vadd.f32 %v2842_v51, %v1237_v16 }
 0x183   :  { %v1167_v19 = vld [vmem:[#allocation2 + $0x1f8] sm:$0xff]  ;;  %1692 = vst.msk [vmem:[%s2952_s4 + $0xf4] sm:$0xf] %vm1630_vm4, %v1932_v34  ;;  %v1206_v22 = vmul.f32 %v2811_v17, %v1135_v18  ;;  %v1340_v24 = vmax.f32 %v1276_v20, 0.0 }
 0x184   :  { %v1238_v23 = vmul.f32 %v2811_v17, %v1167_v19  ;;  %v1372_v25 = vmax.f32 %v1308_v21, 0.0 }
 0x185   :  { %v1277_v26 = vadd.f32 %v2842_v51, %v1206_v22  ;;  %v1901_v28 = vpack.c.bf16 %v1340_v24, %v1340_v24 }
 0x186   :  { %v1309_v27 = vadd.f32 %v2842_v51, %v1238_v23  ;;  %v1933_v29 = vpack.c.bf16 %v1372_v25, %v1372_v25 }
 0x187   :  { %v1341_v30 = vmax.f32 %v1277_v26, 0.0  ;;  %1661 = vst.msk [vmem:[%s2952_s4 + $0x78] sm:$0xf] %vm1630_vm4, %v1901_v28 }
 0x188   :  { %v1373_v31 = vmax.f32 %v1309_v27, 0.0  ;;  %1693 = vst.msk [vmem:[%s2952_s4 + $0xf8] sm:$0xf] %vm1630_vm4, %v1933_v29 }
 0x189   :  { %v1902_v17 = vpack.c.bf16 %v1341_v30, %v1341_v30 }
 0x18a   :  { %v1934_v32 = vpack.c.bf16 %v1373_v31, %v1373_v31 }
 0x18b   :  { %1662 = vst.msk [vmem:[%s2952_s4 + $0x7c] sm:$0xf] %vm1630_vm4, %v1902_v17 }
 0x18c   :  { %1694 = vst.msk [vmem:[%s2952_s4 + $0xfc] sm:$0xf] %vm1630_vm4, %v1934_v32 }

</bundles_post_ra>
